<compile_context>
chip_gen: v7x
topology: tpu7x:2x2x1
jax: 0.10.0
libtpu: 0.0.40
codegen_flags: <defaults>
</compile_context>

<pallas_src>
import functools
import math

import jax
import jax.numpy as jnp
from jax.experimental import pallas as pl
from jax.experimental.pallas import tpu as pltpu

IMAGE_SIZE = (1, 28, 28)
IN_DIM = 1 * 28 * 28            # 784
LAYER_DIMS = [IN_DIM, 512, 256, 128, 64, 32, 1]

_SQRT_2_OVER_PI = math.sqrt(2.0 / math.pi)


def _gelu_tanh(x):
    # tanh-approx GELU: issued on the EUP slot instead of a long VPU erf polynomial.
    return 0.5 * x * (1.0 + jnp.tanh(_SQRT_2_OVER_PI * (x + 0.044715 * x * x * x)))


def _disc_kernel(x_ref,
                 w1, b1, w2, b2, w3, b3, w4, b4, w5, b5, w6, b6,
                 o_ref, *, act_dtype):
    # x_ref: (TB, 784) bf16.  w1..w5: bf16 (in, out).  Biases: f32 (1, out).
    # w6: (1, 32) f32 row vector -- last layer runs on VPU/XLU, not MXU.
    h = x_ref[...]

    def lin_gelu(h_in, w_ref, b_ref):
        acc = jnp.dot(h_in, w_ref[...], preferred_element_type=jnp.float32) + b_ref[...]
        # GELU epilogue in act_dtype (bf16 on v6e/v7x halves the VPU/EUP element count;
        # the f32 accumulation inside the dot is unaffected).
        return _gelu_tanh(acc.astype(act_dtype))

    h = lin_gelu(h, w1, b1).astype(jnp.bfloat16)
    h = lin_gelu(h, w2, b2).astype(jnp.bfloat16)
    h = lin_gelu(h, w3, b3).astype(jnp.bfloat16)
    h = lin_gelu(h, w4, b4).astype(jnp.bfloat16)
    h = lin_gelu(h, w5, b5)

    # 32 -> 1: an N=1 matmul wastes MXU lanes; do a VPU multiply + lane reduction instead.
    logits = jnp.sum(h.astype(jnp.float32) * w6[...], axis=-1, keepdims=True) + b6[...]
    o_ref[...] = jax.nn.sigmoid(logits).astype(o_ref.dtype)


def init_params(key):
    """Deterministic PyTorch-default-style init: U(-1/sqrt(fan_in), 1/sqrt(fan_in))."""
    params = []
    for i in range(len(LAYER_DIMS) - 1):
        fan_in, fan_out = LAYER_DIMS[i], LAYER_DIMS[i + 1]
        key, kw, kb = jax.random.split(key, 3)
        bound = 1.0 / math.sqrt(fan_in)
        w = jax.random.uniform(kw, (fan_in, fan_out), jnp.float32, -bound, bound)
        b = jax.random.uniform(kb, (1, fan_out), jnp.float32, -bound, bound)
        params.append((w, b))
    return params


def _prepare_params(params):
    """Pack params for the kernel: bf16 weights for MXU layers, f32 biases, and the last
    weight as a (1, 32) f32 row vector for the VPU reduction."""
    flat = []
    n = len(params)
    for i, (w, b) in enumerate(params):
        if i < n - 1:
            flat.append(w.astype(jnp.bfloat16))
            flat.append(b.astype(jnp.float32))
        else:
            flat.append(w.reshape(1, -1).astype(jnp.float32))   # (1, 32)
            flat.append(b.astype(jnp.float32))                  # (1, 1)
    return flat


def _round_up(n, m):
    return ((n + m - 1) // m) * m


def _bf16_epilogue_ok():
    # v5-generation chips have no bf16 VPU/EUP -> keep the GELU epilogue in f32 there.
    try:
        kind = jax.devices()[0].device_kind.lower()
    except Exception:
        return True
    return "v5" not in kind


def discriminator_forward(image, params, *, tb=1024):
    """image: (B, 1, 28, 28) float32 -> prob (B, 1) float32."""
    batch = image.shape[0]

    # Single wrapper pass over x: reshape is a layout identity; cast to bf16 happens
    # before any padding so padding (if any) touches half the bytes.
    x = image.reshape(batch, -1).astype(jnp.bfloat16)          # (B, 784) bf16

    # Sublane-align the batch; pick the largest tile that amortizes the ~0.35 us
    # per-grid-step overhead, but keep >= 2 grid steps when the batch is large enough
    # so v7x's two TensorCores both get work on the ("parallel",) axis.
    b8 = _round_up(batch, 8)
    tb_eff = min(tb, b8)
    if b8 > 256 and b8 <= tb:
        tb_eff = _round_up(pl.cdiv(b8, 2), 8)
    padded_b = _round_up(b8, tb_eff)
    if padded_b != batch:
        x = jnp.pad(x, ((0, padded_b - batch), (0, 0)))

    flat_params = _prepare_params(params)

    def resident(a):
        # Constant block index -> weights/biases fetched once, VMEM-resident across steps.
        return pl.BlockSpec(a.shape, lambda i: (0,) * a.ndim)

    grid = (padded_b // tb_eff,)
    in_specs = ([pl.BlockSpec((tb_eff, IN_DIM), lambda i: (i, 0))]
                + [resident(a) for a in flat_params])
    out_specs = pl.BlockSpec((tb_eff, 1), lambda i: (i, 0))

    act_dtype = jnp.bfloat16 if _bf16_epilogue_ok() else jnp.float32
    kernel = functools.partial(_disc_kernel, act_dtype=act_dtype)

    # 32 MB covers tb<=1024 comfortably (bf16 x tile + ~1.2 MB resident weights + f32
    # intermediates); larger sweeps get more headroom (still < v7x's 64 MiB/TC).
    vmem_limit = (32 if tb_eff <= 1024 else 48) * 1024 * 1024

    out = pl.pallas_call(
        kernel,
        out_shape=jax.ShapeDtypeStruct((padded_b, 1), jnp.float32),
        grid=grid,
        in_specs=in_specs,
        out_specs=out_specs,
        compiler_params=pltpu.CompilerParams(
            dimension_semantics=("parallel",),        # megacore sharding on v7x
            vmem_limit_bytes=vmem_limit),
    )(x, *flat_params)

    # Padded rows hold sigmoid(bias-only) garbage; this slice removes them.
    return out[:batch]


if __name__ == "__main__":
    key = jax.random.PRNGKey(0)
    key, pkey, xkey = jax.random.split(key, 3)

    params = init_params(pkey)
    image = jax.random.normal(xkey, (2, 1, 28, 28), dtype=jnp.float32)

    prob = jax.block_until_ready(discriminator_forward(image, params))

    # Sanity: shape (B, 1), values in (0, 1).
    assert prob.shape == (2, 1)
    assert bool(jnp.all((prob > 0.0) & (prob < 1.0)))

    # Pure-JAX f32 reference with exact erf GELU. Kernel uses bf16 matmul operands and
    # tanh-approx GELU (bf16 epilogue on v6e/v7x), so compare with a loose tolerance.
    x = image.reshape(image.shape[0], -1)
    h = x
    for i, (w, b) in enumerate(params):
        h = h @ w + b
        if i < len(params) - 1:
            h = 0.5 * h * (1.0 + jax.lax.erf(h / jnp.sqrt(2.0)))
    ref = jax.nn.sigmoid(h)
    assert bool(jnp.allclose(prob, ref, atol=5e-2)), (prob, ref)

    print("KERNEL_OK")
</pallas_src>

<mosaic_0001>
module attributes {stable_mosaic.version = 11 : i64} {
  func.func @_disc_kernel(%arg0: i32, %arg1: memref<8x784xbf16, #tpu.memory_space<vmem>>, %arg2: memref<784x512xbf16, #tpu.memory_space<vmem>>, %arg3: memref<1x512xf32, #tpu.memory_space<vmem>>, %arg4: memref<512x256xbf16, #tpu.memory_space<vmem>>, %arg5: memref<1x256xf32, #tpu.memory_space<vmem>>, %arg6: memref<256x128xbf16, #tpu.memory_space<vmem>>, %arg7: memref<1x128xf32, #tpu.memory_space<vmem>>, %arg8: memref<128x64xbf16, #tpu.memory_space<vmem>>, %arg9: memref<1x64xf32, #tpu.memory_space<vmem>>, %arg10: memref<64x32xbf16, #tpu.memory_space<vmem>>, %arg11: memref<1x32xf32, #tpu.memory_space<vmem>>, %arg12: memref<1x32xf32, #tpu.memory_space<vmem>>, %arg13: memref<1x1xf32, #tpu.memory_space<vmem>>, %arg14: memref<8x1xf32, #tpu.memory_space<vmem>>) attributes {dimension_semantics = [#tpu.dimension_semantics<parallel>], iteration_bounds = array<i64: 1>, scalar_prefetch = 0 : i64, scratch_operands = 0 : i64, tpu.core_type = #tpu.core_type<tc>, window_params = [{transform_indices = @transform_0, window_bounds = array<i64: 8, 784>}, {pipeline_mode = #tpu.pipeline_mode<synchronous>, transform_indices = @transform_1, window_bounds = array<i64: 784, 512>}, {pipeline_mode = #tpu.pipeline_mode<synchronous>, transform_indices = @transform_2, window_bounds = array<i64: 1, 512>}, {pipeline_mode = #tpu.pipeline_mode<synchronous>, transform_indices = @transform_3, window_bounds = array<i64: 512, 256>}, {pipeline_mode = #tpu.pipeline_mode<synchronous>, transform_indices = @transform_4, window_bounds = array<i64: 1, 256>}, {pipeline_mode = #tpu.pipeline_mode<synchronous>, transform_indices = @transform_5, window_bounds = array<i64: 256, 128>}, {pipeline_mode = #tpu.pipeline_mode<synchronous>, transform_indices = @transform_6, window_bounds = array<i64: 1, 128>}, {pipeline_mode = #tpu.pipeline_mode<synchronous>, transform_indices = @transform_7, window_bounds = array<i64: 128, 64>}, {pipeline_mode = #tpu.pipeline_mode<synchronous>, transform_indices = @transform_8, window_bounds = array<i64: 1, 64>}, {pipeline_mode = #tpu.pipeline_mode<synchronous>, transform_indices = @transform_9, window_bounds = array<i64: 64, 32>}, {pipeline_mode = #tpu.pipeline_mode<synchronous>, transform_indices = @transform_10, window_bounds = array<i64: 1, 32>}, {pipeline_mode = #tpu.pipeline_mode<synchronous>, transform_indices = @transform_11, window_bounds = array<i64: 1, 32>}, {pipeline_mode = #tpu.pipeline_mode<synchronous>, transform_indices = @transform_12, window_bounds = array<i64: 1, 1>}, {transform_indices = @transform_13, window_bounds = array<i64: 8, 1>}]} {
    %c0 = arith.constant 0 : index
    %c0_0 = arith.constant 0 : index
    %0 = vector.load %arg1[%c0, %c0_0] : memref<8x784xbf16, #tpu.memory_space<vmem>>, vector<8x784xbf16>
    %c0_1 = arith.constant 0 : index
    %c0_2 = arith.constant 0 : index
    %1 = vector.load %arg2[%c0_1, %c0_2] : memref<784x512xbf16, #tpu.memory_space<vmem>>, vector<784x512xbf16>
    %cst = arith.constant dense<0.000000e+00> : vector<8x512xf32>
    %2 = tpu.matmul %0, %1, %cst {dimension_numbers = #tpu.dot_dimension_numbers<[1], [0], [0], [1], [0, 0, 1, 1], [], []>} : vector<8x784xbf16>, vector<784x512xbf16>, vector<8x512xf32> -> vector<8x512xf32>
    %c0_3 = arith.constant 0 : index
    %c0_4 = arith.constant 0 : index
    %3 = vector.load %arg3[%c0_3, %c0_4] : memref<1x512xf32, #tpu.memory_space<vmem>>, vector<1x512xf32>
    %4 = vector.broadcast %3 : vector<1x512xf32> to vector<8x512xf32>
    %5 = arith.addf %2, %4 : vector<8x512xf32>
    %6 = arith.truncf %5 : vector<8x512xf32> to vector<8x512xbf16>
    %cst_5 = arith.constant 5.000000e-01 : bf16
    %7 = vector.broadcast %cst_5 : bf16 to vector<8x512xbf16>
    %8 = arith.mulf %7, %6 : vector<8x512xbf16>
    %cst_6 = arith.constant 4.467770e-02 : bf16
    %9 = vector.broadcast %cst_6 : bf16 to vector<8x512xbf16>
    %10 = arith.mulf %9, %6 : vector<8x512xbf16>
    %11 = arith.mulf %10, %6 : vector<8x512xbf16>
    %12 = arith.mulf %11, %6 : vector<8x512xbf16>
    %13 = arith.addf %6, %12 : vector<8x512xbf16>
    %cst_7 = arith.constant 7.968750e-01 : bf16
    %14 = vector.broadcast %cst_7 : bf16 to vector<8x512xbf16>
    %15 = arith.mulf %14, %13 : vector<8x512xbf16>
    %16 = math.tanh %15 : vector<8x512xbf16>
    %cst_8 = arith.constant 1.000000e+00 : bf16
    %17 = vector.broadcast %cst_8 : bf16 to vector<8x512xbf16>
    %18 = arith.addf %17, %16 : vector<8x512xbf16>
    %19 = arith.mulf %8, %18 : vector<8x512xbf16>
    %c0_9 = arith.constant 0 : index
    %c0_10 = arith.constant 0 : index
    %20 = vector.load %arg4[%c0_9, %c0_10] : memref<512x256xbf16, #tpu.memory_space<vmem>>, vector<512x256xbf16>
    %cst_11 = arith.constant dense<0.000000e+00> : vector<8x256xf32>
    %21 = tpu.matmul %19, %20, %cst_11 {dimension_numbers = #tpu.dot_dimension_numbers<[1], [0], [0], [1], [0, 0, 1, 1], [], []>} : vector<8x512xbf16>, vector<512x256xbf16>, vector<8x256xf32> -> vector<8x256xf32>
    %c0_12 = arith.constant 0 : index
    %c0_13 = arith.constant 0 : index
    %22 = vector.load %arg5[%c0_12, %c0_13] : memref<1x256xf32, #tpu.memory_space<vmem>>, vector<1x256xf32>
    %23 = vector.broadcast %22 : vector<1x256xf32> to vector<8x256xf32>
    %24 = arith.addf %21, %23 : vector<8x256xf32>
    %25 = arith.truncf %24 : vector<8x256xf32> to vector<8x256xbf16>
    %cst_14 = arith.constant 5.000000e-01 : bf16
    %26 = vector.broadcast %cst_14 : bf16 to vector<8x256xbf16>
    %27 = arith.mulf %26, %25 : vector<8x256xbf16>
    %cst_15 = arith.constant 4.467770e-02 : bf16
    %28 = vector.broadcast %cst_15 : bf16 to vector<8x256xbf16>
    %29 = arith.mulf %28, %25 : vector<8x256xbf16>
    %30 = arith.mulf %29, %25 : vector<8x256xbf16>
    %31 = arith.mulf %30, %25 : vector<8x256xbf16>
    %32 = arith.addf %25, %31 : vector<8x256xbf16>
    %cst_16 = arith.constant 7.968750e-01 : bf16
    %33 = vector.broadcast %cst_16 : bf16 to vector<8x256xbf16>
    %34 = arith.mulf %33, %32 : vector<8x256xbf16>
    %35 = math.tanh %34 : vector<8x256xbf16>
    %cst_17 = arith.constant 1.000000e+00 : bf16
    %36 = vector.broadcast %cst_17 : bf16 to vector<8x256xbf16>
    %37 = arith.addf %36, %35 : vector<8x256xbf16>
    %38 = arith.mulf %27, %37 : vector<8x256xbf16>
    %c0_18 = arith.constant 0 : index
    %c0_19 = arith.constant 0 : index
    %39 = vector.load %arg6[%c0_18, %c0_19] : memref<256x128xbf16, #tpu.memory_space<vmem>>, vector<256x128xbf16>
    %cst_20 = arith.constant dense<0.000000e+00> : vector<8x128xf32>
    %40 = tpu.matmul %38, %39, %cst_20 {dimension_numbers = #tpu.dot_dimension_numbers<[1], [0], [0], [1], [0, 0, 1, 1], [], []>} : vector<8x256xbf16>, vector<256x128xbf16>, vector<8x128xf32> -> vector<8x128xf32>
    %c0_21 = arith.constant 0 : index
    %c0_22 = arith.constant 0 : index
    %41 = vector.load %arg7[%c0_21, %c0_22] : memref<1x128xf32, #tpu.memory_space<vmem>>, vector<1x128xf32>
    %42 = vector.broadcast %41 : vector<1x128xf32> to vector<8x128xf32>
    %43 = arith.addf %40, %42 : vector<8x128xf32>
    %44 = arith.truncf %43 : vector<8x128xf32> to vector<8x128xbf16>
    %cst_23 = arith.constant 5.000000e-01 : bf16
    %45 = vector.broadcast %cst_23 : bf16 to vector<8x128xbf16>
    %46 = arith.mulf %45, %44 : vector<8x128xbf16>
    %cst_24 = arith.constant 4.467770e-02 : bf16
    %47 = vector.broadcast %cst_24 : bf16 to vector<8x128xbf16>
    %48 = arith.mulf %47, %44 : vector<8x128xbf16>
    %49 = arith.mulf %48, %44 : vector<8x128xbf16>
    %50 = arith.mulf %49, %44 : vector<8x128xbf16>
    %51 = arith.addf %44, %50 : vector<8x128xbf16>
    %cst_25 = arith.constant 7.968750e-01 : bf16
    %52 = vector.broadcast %cst_25 : bf16 to vector<8x128xbf16>
    %53 = arith.mulf %52, %51 : vector<8x128xbf16>
    %54 = math.tanh %53 : vector<8x128xbf16>
    %cst_26 = arith.constant 1.000000e+00 : bf16
    %55 = vector.broadcast %cst_26 : bf16 to vector<8x128xbf16>
    %56 = arith.addf %55, %54 : vector<8x128xbf16>
    %57 = arith.mulf %46, %56 : vector<8x128xbf16>
    %c0_27 = arith.constant 0 : index
    %c0_28 = arith.constant 0 : index
    %58 = vector.load %arg8[%c0_27, %c0_28] : memref<128x64xbf16, #tpu.memory_space<vmem>>, vector<128x64xbf16>
    %cst_29 = arith.constant dense<0.000000e+00> : vector<8x64xf32>
    %59 = tpu.matmul %57, %58, %cst_29 {dimension_numbers = #tpu.dot_dimension_numbers<[1], [0], [0], [1], [0, 0, 1, 1], [], []>} : vector<8x128xbf16>, vector<128x64xbf16>, vector<8x64xf32> -> vector<8x64xf32>
    %c0_30 = arith.constant 0 : index
    %c0_31 = arith.constant 0 : index
    %60 = vector.load %arg9[%c0_30, %c0_31] : memref<1x64xf32, #tpu.memory_space<vmem>>, vector<1x64xf32>
    %61 = vector.broadcast %60 : vector<1x64xf32> to vector<8x64xf32>
    %62 = arith.addf %59, %61 : vector<8x64xf32>
    %63 = arith.truncf %62 : vector<8x64xf32> to vector<8x64xbf16>
    %cst_32 = arith.constant 5.000000e-01 : bf16
    %64 = vector.broadcast %cst_32 : bf16 to vector<8x64xbf16>
    %65 = arith.mulf %64, %63 : vector<8x64xbf16>
    %cst_33 = arith.constant 4.467770e-02 : bf16
    %66 = vector.broadcast %cst_33 : bf16 to vector<8x64xbf16>
    %67 = arith.mulf %66, %63 : vector<8x64xbf16>
    %68 = arith.mulf %67, %63 : vector<8x64xbf16>
    %69 = arith.mulf %68, %63 : vector<8x64xbf16>
    %70 = arith.addf %63, %69 : vector<8x64xbf16>
    %cst_34 = arith.constant 7.968750e-01 : bf16
    %71 = vector.broadcast %cst_34 : bf16 to vector<8x64xbf16>
    %72 = arith.mulf %71, %70 : vector<8x64xbf16>
    %73 = math.tanh %72 : vector<8x64xbf16>
    %cst_35 = arith.constant 1.000000e+00 : bf16
    %74 = vector.broadcast %cst_35 : bf16 to vector<8x64xbf16>
    %75 = arith.addf %74, %73 : vector<8x64xbf16>
    %76 = arith.mulf %65, %75 : vector<8x64xbf16>
    %c0_36 = arith.constant 0 : index
    %c0_37 = arith.constant 0 : index
    %77 = vector.load %arg10[%c0_36, %c0_37] : memref<64x32xbf16, #tpu.memory_space<vmem>>, vector<64x32xbf16>
    %cst_38 = arith.constant dense<0.000000e+00> : vector<8x32xf32>
    %78 = tpu.matmul %76, %77, %cst_38 {dimension_numbers = #tpu.dot_dimension_numbers<[1], [0], [0], [1], [0, 0, 1, 1], [], []>} : vector<8x64xbf16>, vector<64x32xbf16>, vector<8x32xf32> -> vector<8x32xf32>
    %c0_39 = arith.constant 0 : index
    %c0_40 = arith.constant 0 : index
    %79 = vector.load %arg11[%c0_39, %c0_40] : memref<1x32xf32, #tpu.memory_space<vmem>>, vector<1x32xf32>
    %80 = vector.broadcast %79 : vector<1x32xf32> to vector<8x32xf32>
    %81 = arith.addf %78, %80 : vector<8x32xf32>
    %82 = arith.truncf %81 : vector<8x32xf32> to vector<8x32xbf16>
    %cst_41 = arith.constant 5.000000e-01 : bf16
    %83 = vector.broadcast %cst_41 : bf16 to vector<8x32xbf16>
    %84 = arith.mulf %83, %82 : vector<8x32xbf16>
    %cst_42 = arith.constant 4.467770e-02 : bf16
    %85 = vector.broadcast %cst_42 : bf16 to vector<8x32xbf16>
    %86 = arith.mulf %85, %82 : vector<8x32xbf16>
    %87 = arith.mulf %86, %82 : vector<8x32xbf16>
    %88 = arith.mulf %87, %82 : vector<8x32xbf16>
    %89 = arith.addf %82, %88 : vector<8x32xbf16>
    %cst_43 = arith.constant 7.968750e-01 : bf16
    %90 = vector.broadcast %cst_43 : bf16 to vector<8x32xbf16>
    %91 = arith.mulf %90, %89 : vector<8x32xbf16>
    %92 = math.tanh %91 : vector<8x32xbf16>
    %cst_44 = arith.constant 1.000000e+00 : bf16
    %93 = vector.broadcast %cst_44 : bf16 to vector<8x32xbf16>
    %94 = arith.addf %93, %92 : vector<8x32xbf16>
    %95 = arith.mulf %84, %94 : vector<8x32xbf16>
    %96 = arith.extf %95 : vector<8x32xbf16> to vector<8x32xf32>
    %c0_45 = arith.constant 0 : index
    %c0_46 = arith.constant 0 : index
    %97 = vector.load %arg12[%c0_45, %c0_46] : memref<1x32xf32, #tpu.memory_space<vmem>>, vector<1x32xf32>
    %98 = vector.broadcast %97 : vector<1x32xf32> to vector<8x32xf32>
    %99 = arith.mulf %96, %98 : vector<8x32xf32>
    %cst_47 = arith.constant dense<0.000000e+00> : vector<8xf32>
    %100 = vector.multi_reduction <add>, %99, %cst_47 [1] : vector<8x32xf32> to vector<8xf32>
    %101 = vector.shape_cast %100 : vector<8xf32> to vector<8x1xf32>
    %c0_48 = arith.constant 0 : index
    %c0_49 = arith.constant 0 : index
    %102 = vector.load %arg13[%c0_48, %c0_49] : memref<1x1xf32, #tpu.memory_space<vmem>>, vector<1x1xf32>
    %103 = vector.broadcast %102 : vector<1x1xf32> to vector<8x1xf32>
    %104 = arith.addf %101, %103 : vector<8x1xf32>
    %105 = arith.negf %104 : vector<8x1xf32>
    %106 = math.exp %105 : vector<8x1xf32>
    %cst_50 = arith.constant 1.000000e+00 : f32
    %107 = vector.broadcast %cst_50 : f32 to vector<8x1xf32>
    %108 = arith.addf %107, %106 : vector<8x1xf32>
    %109 = arith.divf %107, %108 : vector<8x1xf32>
    %c0_51 = arith.constant 0 : index
    %c0_52 = arith.constant 0 : index
    %110 = vector.load %arg14[%c0_51, %c0_52] : memref<8x1xf32, #tpu.memory_space<vmem>>, vector<8x1xf32>
    tpu.vector_store %arg14[%c0_51, %c0_52], %109 {strides = array<i32>} : memref<8x1xf32, #tpu.memory_space<vmem>>, vector<8x1xf32>,
    return
  }
  func.func @transform_0(%arg0: i32) -> (i32, i32) {
    %c0_i32 = arith.constant 0 : i32
    %c0_i32_0 = arith.constant 0 : i32
    return %arg0, %c0_i32 : i32, i32
  }
  func.func @transform_1(%arg0: i32) -> (i32, i32) {
    %c0_i32 = arith.constant 0 : i32
    %c0_i32_0 = arith.constant 0 : i32
    %c0_i32_1 = arith.constant 0 : i32
    return %c0_i32, %c0_i32_0 : i32, i32
  }
  func.func @transform_2(%arg0: i32) -> (i32, i32) {
    %c0_i32 = arith.constant 0 : i32
    %c0_i32_0 = arith.constant 0 : i32
    %c0_i32_1 = arith.constant 0 : i32
    return %c0_i32, %c0_i32_0 : i32, i32
  }
  func.func @transform_3(%arg0: i32) -> (i32, i32) {
    %c0_i32 = arith.constant 0 : i32
    %c0_i32_0 = arith.constant 0 : i32
    %c0_i32_1 = arith.constant 0 : i32
    return %c0_i32, %c0_i32_0 : i32, i32
  }
  func.func @transform_4(%arg0: i32) -> (i32, i32) {
    %c0_i32 = arith.constant 0 : i32
    %c0_i32_0 = arith.constant 0 : i32
    %c0_i32_1 = arith.constant 0 : i32
    return %c0_i32, %c0_i32_0 : i32, i32
  }
  func.func @transform_5(%arg0: i32) -> (i32, i32) {
    %c0_i32 = arith.constant 0 : i32
    %c0_i32_0 = arith.constant 0 : i32
    %c0_i32_1 = arith.constant 0 : i32
    return %c0_i32, %c0_i32_0 : i32, i32
  }
  func.func @transform_6(%arg0: i32) -> (i32, i32) {
    %c0_i32 = arith.constant 0 : i32
    %c0_i32_0 = arith.constant 0 : i32
    %c0_i32_1 = arith.constant 0 : i32
    return %c0_i32, %c0_i32_0 : i32, i32
  }
  func.func @transform_7(%arg0: i32) -> (i32, i32) {
    %c0_i32 = arith.constant 0 : i32
    %c0_i32_0 = arith.constant 0 : i32
    %c0_i32_1 = arith.constant 0 : i32
    return %c0_i32, %c0_i32_0 : i32, i32
  }
  func.func @transform_8(%arg0: i32) -> (i32, i32) {
    %c0_i32 = arith.constant 0 : i32
    %c0_i32_0 = arith.constant 0 : i32
    %c0_i32_1 = arith.constant 0 : i32
    return %c0_i32, %c0_i32_0 : i32, i32
  }
  func.func @transform_9(%arg0: i32) -> (i32, i32) {
    %c0_i32 = arith.constant 0 : i32
    %c0_i32_0 = arith.constant 0 : i32
    %c0_i32_1 = arith.constant 0 : i32
    return %c0_i32, %c0_i32_0 : i32, i32
  }
  func.func @transform_10(%arg0: i32) -> (i32, i32) {
    %c0_i32 = arith.constant 0 : i32
    %c0_i32_0 = arith.constant 0 : i32
    %c0_i32_1 = arith.constant 0 : i32
    return %c0_i32, %c0_i32_0 : i32, i32
  }
  func.func @transform_11(%arg0: i32) -> (i32, i32) {
    %c0_i32 = arith.constant 0 : i32
    %c0_i32_0 = arith.constant 0 : i32
    %c0_i32_1 = arith.constant 0 : i32
    return %c0_i32, %c0_i32_0 : i32, i32
  }
  func.func @transform_12(%arg0: i32) -> (i32, i32) {
    %c0_i32 = arith.constant 0 : i32
    %c0_i32_0 = arith.constant 0 : i32
    %c0_i32_1 = arith.constant 0 : i32
    return %c0_i32, %c0_i32_0 : i32, i32
  }
  func.func @transform_13(%arg0: i32) -> (i32, i32) {
    %c0_i32 = arith.constant 0 : i32
    %c0_i32_0 = arith.constant 0 : i32
    return %arg0, %c0_i32 : i32, i32
  }
}

</mosaic_0001>

<bundles_post_ra>
// kernel: tpu_custom_call.1
= control target key start
LH: loop header
LB: loop body
LE: loop exit
PB: predicated region body
PF: predicated region fallthrough
CT: control target
= control target key end

     0   :  { %s3954_s0 = inlined_call_operand.hbm [shape: bf16[8,784], index: 0, kind: input, shape index: {}]   ;;  %s3955_s1 = inlined_call_operand.hbm [shape: bf16[784,512], index: 1, kind: input, shape index: {}]   ;;  %s3956_s2 = inlined_call_operand.hbm [shape: f32[1,512], index: 2, kind: input, shape index: {}]   ;;  %s3957_s3 = inlined_call_operand.hbm [shape: bf16[512,256], index: 3, kind: input, shape index: {}]   ;;  %s3958_s4 = inlined_call_operand.vmem [shape: f32[1,256], index: 4, kind: input, shape index: {}]   ;;  %s3959_s5 = inlined_call_operand.vmem [shape: bf16[256,128], index: 5, kind: input, shape index: {}]   ;;  %s3960_s6 = inlined_call_operand.hbm [shape: f32[1,128], index: 6, kind: input, shape index: {}]   ;;  %s3961_s7 = inlined_call_operand.vmem [shape: bf16[128,64], index: 7, kind: input, shape index: {}]   ;;  %s3962_s8 = inlined_call_operand.hbm [shape: f32[1,64], index: 8, kind: input, shape index: {}]   ;;  %s3963_s9 = inlined_call_operand.vmem [shape: bf16[64,32], index: 9, kind: input, shape index: {}]   ;;  %s3964_s10 = inlined_call_operand.vmem [shape: f32[1,32], index: 10, kind: input, shape index: {}]   ;;  %s3965_s11 = inlined_call_operand.vmem [shape: f32[1,32], index: 11, kind: input, shape index: {}]   ;;  %s3966_s12 = inlined_call_operand.<no memory space> [shape: f32[1,1], index: 12, kind: input, shape index: {}]   ;;  %s3967_s13 = inlined_call_operand.vmem [shape: f32[8,1], index: 13, kind: output, shape index: {}]  }
   0x1   :  { %v18_v0 = vstv %s3966_s12 }
   0x2   :  { %19 = vst [vmem:[#allocation2] sm:$0x1] %v18_v0 }
   0x3   :  { %20 = vsyncpa [#allocation4], 0 }
   0x4   :  { %21 = vsyncpa [#allocation6], 0 }
   0x5   :  { %22 = vsyncpa [#allocation9], 0 }
   0x6   :  { %23 = vsyncpa [#allocation12], 0  ;;  %s3662_s27 = smov [#allocation5]   ;;  %s3522_s14 = scalar_lea.hbm %s3955_s1, 25088 }
   0x7   :  { %s39_s28 = sshll.u32 %s3662_s27, 4  ;;  %p3523_p0 = scmp.ne.s32.totalorder %s3955_s1, %s3522_s14  ;;  %s40_s28 = int_to_ptr.vmem [resolvable:$true] %s39_s28 }
   0x8   :  { %p3526_p1 = scmp.lt.u32.totalorder %s3522_s14, %s3955_s1 }
   0xa   :  { %p3528_p2 = pnand %p3526_p1, %p3523_p0 }
   0xc   :  { %3531 = shalt.err (!%p3528_p2)
}
   0xd   :  { %s3532_s12 = scalar_lea.vmem %s40_s28, 25088  ;;  %p3537_p4 = scmp.lt.s32.totalorder %s40_s28, %s40_s28 }
   0xe   :  { %p3533_p3 = scmp.ne.s32.totalorder %s40_s28, %s3532_s12  ;;  %p3538_p5 = scmp.lt.s32.totalorder %s3532_s12, %s3532_s12 }
  0x10   :  { %p3539_p6 = por %p3538_p5, %p3537_p4 }
  0x12   :  { %p3540_p7 = pnand %p3539_p6, %p3533_p3 }
  0x14   :  { %3543 = shalt.err (!%p3540_p7)
}
  0x15   :  { %s3663_s19 = smov 256   ;;  %s3664_s20 = smov 16  }
  0x16   :  { %45 = dma.hbm_to_vmem [thread:$0]  %s3955_s1, 25088, %s40_s28, [#allocation6], %s3663_s19, %s3663_s19, %s3664_s20  }
  0x17   :  { %s3665_s23 = smov [#allocation8]   ;;  %s3544_s27 = scalar_lea.hbm %s3957_s3, 8192 }
  0x18   :  { %s61_s24 = sshll.u32 %s3665_s23, 4  ;;  %p3545_p8 = scmp.ne.s32.totalorder %s3957_s3, %s3544_s27  ;;  %s62_s24 = int_to_ptr.vmem [resolvable:$true] %s61_s24 }
  0x19   :  { %p3548_p9 = scmp.lt.u32.totalorder %s3544_s27, %s3957_s3 }
  0x1b   :  { %p3550_p10 = pnand %p3548_p9, %p3545_p8 }
  0x1d   :  { %3553 = shalt.err (!%p3550_p10)
}
  0x1e   :  { %s3554_s16 = scalar_lea.vmem %s62_s24, 8192  ;;  %p3559_p12 = scmp.lt.s32.totalorder %s62_s24, %s62_s24 }
  0x1f   :  { %p3555_p11 = scmp.ne.s32.totalorder %s62_s24, %s3554_s16  ;;  %p3560_p13 = scmp.lt.s32.totalorder %s3554_s16, %s3554_s16 }
  0x21   :  { %p3561_p0 = por %p3560_p13, %p3559_p12 }
  0x23   :  { %p3562_p1 = pnand %p3561_p0, %p3555_p11 }
  0x25   :  { %3565 = shalt.err (!%p3562_p1)
}
  0x26   :  { %s3666_s1 = smov 128   ;;  %s3667_s28 = smov 8  }
  0x27   :  { %67 = dma.hbm_to_vmem [thread:$0]  %s3957_s3, 8192, %s62_s24, [#allocation9], %s3666_s1, %s3666_s1, %s3667_s28  }
  0x28   :  { %s3668_s12 = smov [#allocation3]   ;;  %s3669_s20 = smov [#allocation7]  }
  0x29   :  { %s30_s19 = sshll.u32 %s3668_s12, 4  ;;  %s52_s21 = sshll.u32 %s3669_s20, 4  ;;  %s31_s19 = int_to_ptr.vmem [resolvable:$true] %s30_s19  ;;  %s53_s21 = int_to_ptr.vmem [resolvable:$true] %s52_s21 }
  0x2a   :  { %s3566_s25 = scalar_lea.hbm %s3954_s0, 448 }
  0x2b   :  { %p3567_p2 = scmp.ne.s32.totalorder %s3954_s0, %s3566_s25  ;;  %p3570_p3 = scmp.lt.u32.totalorder %s3566_s25, %s3954_s0 }
  0x2d   :  { %p3572_p4 = pnand %p3570_p3, %p3567_p2 }
  0x2f   :  { %3575 = shalt.err (!%p3572_p4)
}
  0x30   :  { %s3576_s3 = scalar_lea.vmem %s31_s19, 448  ;;  %p3581_p6 = scmp.lt.s32.totalorder %s31_s19, %s31_s19 }
  0x31   :  { %p3577_p5 = scmp.ne.s32.totalorder %s31_s19, %s3576_s3  ;;  %p3582_p7 = scmp.lt.s32.totalorder %s3576_s3, %s3576_s3 }
  0x33   :  { %p3583_p8 = por %p3582_p7, %p3581_p6 }
  0x35   :  { %p3584_p9 = pnand %p3583_p8, %p3577_p5 }
  0x37   :  { %3587 = shalt.err (!%p3584_p9)
}
  0x38   :  { %33 = dma.hbm_to_vmem [thread:$0]  %s3954_s0, 448, %s31_s19, [#allocation4]  }
  0x39   :  { %s3588_s1 = scalar_lea.hbm %s3956_s2, 64 }
  0x3a   :  { %p3589_p10 = scmp.ne.s32.totalorder %s3956_s2, %s3588_s1  ;;  %p3592_p11 = scmp.lt.u32.totalorder %s3588_s1, %s3956_s2 }
  0x3c   :  { %p3594_p12 = pnand %p3592_p11, %p3589_p10 }
  0x3e   :  { %3597 = shalt.err (!%p3594_p12)
}
  0x3f   :  { %s3598_s20 = scalar_lea.vmem %s53_s21, 64  ;;  %p3603_p0 = scmp.lt.s32.totalorder %s53_s21, %s53_s21 }
  0x40   :  { %p3599_p13 = scmp.ne.s32.totalorder %s53_s21, %s3598_s20  ;;  %p3604_p1 = scmp.lt.s32.totalorder %s3598_s20, %s3598_s20 }
  0x42   :  { %p3605_p2 = por %p3604_p1, %p3603_p0 }
  0x44   :  { %p3606_p3 = pnand %p3605_p2, %p3599_p13 }
  0x46   :  { %3609 = shalt.err (!%p3606_p3)
}
  0x47   :  { %55 = dma.hbm_to_vmem [thread:$0]  %s3956_s2, 64, %s53_s21, [#allocation6]  }
  0x48   :  { %s3670_s22 = smov [#allocation10]   ;;  %s3671_s25 = smov [#allocation11]  }
  0x49   :  { %s78_s23 = sshll.u32 %s3670_s22, 4  ;;  %s90_s26 = sshll.u32 %s3671_s25, 4  ;;  %s79_s23 = int_to_ptr.vmem [resolvable:$true] %s78_s23  ;;  %s91_s26 = int_to_ptr.vmem [resolvable:$true] %s90_s26 }
  0x4a   :  { %s3610_s30 = scalar_lea.hbm %s3960_s6, 16 }
  0x4b   :  { %p3611_p4 = scmp.ne.s32.totalorder %s3960_s6, %s3610_s30  ;;  %p3614_p5 = scmp.lt.u32.totalorder %s3610_s30, %s3960_s6 }
  0x4d   :  { %p3616_p6 = pnand %p3614_p5, %p3611_p4 }
  0x4f   :  { %3619 = shalt.err (!%p3616_p6)
}
  0x50   :  { %s3620_s2 = scalar_lea.vmem %s79_s23, 16  ;;  %s3624_s21 = scalar_lea.vmem %s79_s23, 32 }
  0x51   :  { %p3621_p7 = scmp.ne.s32.totalorder %s79_s23, %s3620_s2  ;;  %p3625_p8 = scmp.lt.s32.totalorder %s79_s23, %s79_s23 }
  0x52   :  { %p3626_p9 = scmp.lt.s32.totalorder %s3624_s21, %s3620_s2 }
  0x54   :  { %p3627_p10 = por %p3626_p9, %p3625_p8 }
  0x56   :  { %p3628_p11 = pnand %p3627_p10, %p3621_p7 }
  0x58   :  { %3631 = shalt.err (!%p3628_p11)
}
  0x59   :  { %81 = dma.hbm_to_vmem [thread:$0]  %s3960_s6, 16, %s79_s23, [#allocation9]  }
  0x5a   :  { %s3632_s18 = scalar_lea.hbm %s3962_s8, 16 }
  0x5b   :  { %p3633_p12 = scmp.ne.s32.totalorder %s3962_s8, %s3632_s18  ;;  %p3636_p13 = scmp.lt.u32.totalorder %s3632_s18, %s3962_s8 }
  0x5d   :  { %p3638_p0 = pnand %p3636_p13, %p3633_p12 }
  0x5f   :  { %3641 = shalt.err (!%p3638_p0)
}
  0x60   :  { %s3642_s22 = scalar_lea.vmem %s91_s26, 16  ;;  %s3646_s25 = scalar_lea.vmem %s91_s26, 32 }
  0x61   :  { %p3643_p1 = scmp.ne.s32.totalorder %s91_s26, %s3642_s22  ;;  %p3647_p2 = scmp.lt.s32.totalorder %s91_s26, %s91_s26 }
  0x62   :  { %p3648_p3 = scmp.lt.s32.totalorder %s3646_s25, %s3642_s22 }
  0x64   :  { %p3649_p4 = por %p3648_p3, %p3647_p2 }
  0x66   :  { %p3650_p5 = pnand %p3649_p4, %p3643_p1 }
  0x68   :  { %3653 = shalt.err (!%p3650_p5)
}
  0x69   :  { %93 = dma.hbm_to_vmem [thread:$0]  %s3962_s8, 16, %s91_s26, [#allocation12]  }
  0x6a   :  { %3654 = dma.done.wait [#allocation4], 448  }
  0x6b   :  { %3655 = vsyncadd [#allocation4], 4294966848 }
  0x6c   :  { %3656 = dma.done.wait [#allocation6], 25152  }
  0x6d   :  { %3657 = vsyncadd [#allocation6], 4294942144 }
  0x6e   :  { %3658 = dma.done.wait [#allocation9], 8208  }
  0x6f   :  { %3659 = vsyncadd [#allocation9], 4294959088 }
  0x70   :  { %3660 = dma.done.wait [#allocation12], 16  }
  0x71   :  { %3661 = vsyncadd [#allocation12], 4294967280  ;;  %v3672_v1 = vmov 0   ;;  %v3074_v2 = vld [vmem:[#allocation5 + $0x4] ss:$16 sps:$4 sm:$0xff]   ;;  %vm1351_vm0 = vcmask 130048  }
  0x72   :  { %1510 = vmatprep.mubr.bf16.mxu1 %v3672_v1  ;;  %v3076_v3 = vld [vmem:[#allocation5 + $0x604] ss:$16 sps:$4 sm:$0xff]   ;;  %1355 = vmatprep.subr.bf16.mxu0 %v3074_v2  ;;  %v3078_v4 = vld [vmem:[#allocation5] ss:$16 sps:$4 sm:$0xff]   ;;  %v3082_v7 = vld [vmem:[#allocation5 + $0x8] ss:$16 sps:$4 sm:$0xff]  }
  0x73   :  { %v3079_v5 = vld [vmem:[#allocation5 + $0x600] ss:$16 sps:$4 sm:$0xff]   ;;  %1478 = vmatprep.subr.bf16.mxu1 %v3076_v3  ;;  %v3080_v6 = vld [vmem:[#allocation5 + $0x24] ss:$16 sps:$4 sm:$0xff]   ;;  %1356 = vmatpush1.bf16.msra.mxu0 %v3078_v4  ;;  %v3084_v8 = vld [vmem:[#allocation5 + $0xc] ss:$16 sps:$4 sm:$0xff]  }
  0x74   :  { %1479 = vmatpush1.bf16.msra.mxu1 %v3079_v5  ;;  %1357 = vmatprep.subr.bf16.mxu0 %v3080_v6  ;;  %v3085_v9 = vld [vmem:[#allocation5 + $0x20] ss:$16 sps:$4 sm:$0xff]   ;;  %v3086_v10 = vld [vmem:[#allocation3 + $0x18] ss:$0 sps:$4 sm:$0xff]   ;;  %v3087_v11 = vld [vmem:[#allocation5 + $0x44] ss:$16 sps:$4 sm:$0xff]  }
  0x75   :  { %1519 = vmatprep.subr.bf16.mxu1 %v3084_v8  ;;  %v3089_v12 = vld [vmem:[#allocation5 + $0x28] ss:$16 sps:$4 sm:$0xff]   ;;  %v3091_v13 = vld [vmem:[#allocation5 + $0x2c] ss:$16 sps:$4 sm:$0xff]   ;;  %v3092_v14 = vld [vmem:[#allocation5 + $0x40] ss:$16 sps:$4 sm:$0xff]  }
  0x76   :  { %v3093_v15 = vld [vmem:[#allocation5 + $0x64] ss:$16 sps:$4 sm:$0xff]   ;;  %v3097_v16 = vld [vmem:[#allocation5 + $0x4c] ss:$16 sps:$4 sm:$0xff]   ;;  %v3095_v17 = vld [vmem:[#allocation5 + $0x48] ss:$16 sps:$4 sm:$0xff]  }
  0x77   :  { %2860 = vmatmul.mubr.msk.bf16.vlgmr.msra.gmra.mrb[0].mxu1 %vm1351_vm0, %v3086_v10  ;;  %1358 = vmatpush1.bf16.msra.mxu0 %v3085_v9  ;;  %v3098_v18 = vld [vmem:[#allocation5 + $0x60] ss:$16 sps:$4 sm:$0xff]   ;;  %v3099_v19 = vld [vmem:[#allocation5 + $0x84] ss:$16 sps:$4 sm:$0xff]   ;;  %v3103_v20 = vld [vmem:[#allocation5 + $0x6c] ss:$16 sps:$4 sm:$0xff]  }
  0x78   :  { %1520 = vmatpush1.bf16.msra.mxu1 %v3082_v7  ;;  %1359 = vmatprep.subr.bf16.mxu0 %v3087_v11  ;;  %v3101_v21 = vld [vmem:[#allocation5 + $0x68] ss:$16 sps:$4 sm:$0xff]   ;;  %v3104_v22 = vld [vmem:[#allocation5 + $0x80] ss:$16 sps:$4 sm:$0xff]   ;;  %v3105_v23 = vld [vmem:[#allocation5 + $0xa4] ss:$16 sps:$4 sm:$0xff]  }
  0x79   :  { %1521 = vmatprep.subr.bf16.mxu1 %v3091_v13  ;;  %v3109_v24 = vld [vmem:[#allocation5 + $0x8c] ss:$16 sps:$4 sm:$0xff]   ;;  %v3107_v25 = vld [vmem:[#allocation5 + $0x88] ss:$16 sps:$4 sm:$0xff]   ;;  %v3110_v26 = vld [vmem:[#allocation5 + $0xa0] ss:$16 sps:$4 sm:$0xff]  }
  0x7a   :  { %v3111_v27 = vld [vmem:[#allocation5 + $0xc4] ss:$16 sps:$4 sm:$0xff]   ;;  %v3115_v28 = vld [vmem:[#allocation5 + $0xac] ss:$16 sps:$4 sm:$0xff]   ;;  %v3113_v29 = vld [vmem:[#allocation5 + $0xa8] ss:$16 sps:$4 sm:$0xff]  }
  0x7b   :  { %1360 = vmatpush1.bf16.msra.mxu0 %v3092_v14  ;;  %v3116_v30 = vld [vmem:[#allocation5 + $0xc0] ss:$16 sps:$4 sm:$0xff]   ;;  %v3117_v31 = vld [vmem:[#allocation5 + $0xe4] ss:$16 sps:$4 sm:$0xff]   ;;  %v3121_v32 = vld [vmem:[#allocation5 + $0xcc] ss:$16 sps:$4 sm:$0xff]  }
  0x7c   :  { %1522 = vmatpush1.bf16.msra.mxu1 %v3089_v12  ;;  %1361 = vmatprep.subr.bf16.mxu0 %v3093_v15  ;;  %v3119_v33 = vld [vmem:[#allocation5 + $0xc8] ss:$16 sps:$4 sm:$0xff]   ;;  %v3122_v34 = vld [vmem:[#allocation5 + $0xe0] ss:$16 sps:$4 sm:$0xff]   ;;  %v3123_v35 = vld [vmem:[#allocation5 + $0x104] ss:$16 sps:$4 sm:$0xff]  }
  0x7d   :  { %1523 = vmatprep.subr.bf16.mxu1 %v3097_v16  ;;  %v3127_v36 = vld [vmem:[#allocation5 + $0xec] ss:$16 sps:$4 sm:$0xff]   ;;  %v3125_v37 = vld [vmem:[#allocation5 + $0xe8] ss:$16 sps:$4 sm:$0xff]   ;;  %v3128_v38 = vld [vmem:[#allocation5 + $0x100] ss:$16 sps:$4 sm:$0xff]  }
  0x7e   :  { %v3129_v39 = vld [vmem:[#allocation5 + $0x124] ss:$16 sps:$4 sm:$0xff]   ;;  %v3133_v40 = vld [vmem:[#allocation5 + $0x10c] ss:$16 sps:$4 sm:$0xff]   ;;  %v3131_v41 = vld [vmem:[#allocation5 + $0x108] ss:$16 sps:$4 sm:$0xff]  }
  0x7f   :  { %1362 = vmatpush1.bf16.msra.mxu0 %v3098_v18  ;;  %v3134_v42 = vld [vmem:[#allocation5 + $0x120] ss:$16 sps:$4 sm:$0xff]   ;;  %v3135_v43 = vld [vmem:[#allocation5 + $0x144] ss:$16 sps:$4 sm:$0xff]   ;;  %v3139_v44 = vld [vmem:[#allocation5 + $0x12c] ss:$16 sps:$4 sm:$0xff]  }
  0x80   :  { %1524 = vmatpush1.bf16.msra.mxu1 %v3095_v17  ;;  %1363 = vmatprep.subr.bf16.mxu0 %v3099_v19  ;;  %v3137_v45 = vld [vmem:[#allocation5 + $0x128] ss:$16 sps:$4 sm:$0xff]   ;;  %v3140_v46 = vld [vmem:[#allocation5 + $0x140] ss:$16 sps:$4 sm:$0xff]   ;;  %v3141_v47 = vld [vmem:[#allocation5 + $0x164] ss:$16 sps:$4 sm:$0xff]  }
  0x81   :  { %1525 = vmatprep.subr.bf16.mxu1 %v3103_v20  ;;  %v3145_v48 = vld [vmem:[#allocation5 + $0x14c] ss:$16 sps:$4 sm:$0xff]   ;;  %v3143_v49 = vld [vmem:[#allocation5 + $0x148] ss:$16 sps:$4 sm:$0xff]   ;;  %v3146_v51 = vld [vmem:[#allocation5 + $0x160] ss:$16 sps:$4 sm:$0xff]  }
  0x82   :  { %v125_v50 = vld [vmem:[#allocation3] sm:$0xff]  ;;  %v3151_v54 = vld [vmem:[#allocation5 + $0x16c] ss:$16 sps:$4 sm:$0xff]   ;;  %v3152_v56 = vld [vmem:[#allocation5 + $0x180] ss:$16 sps:$4 sm:$0xff]   ;;  %vm3674_vm1 = vmmov 0  }
  0x83   :  { %1364 = vmatpush1.bf16.msra.mxu0 %v3104_v22  ;;  %v3147_v52 = vld [vmem:[#allocation5 + $0x184] ss:$16 sps:$4 sm:$0xff]   ;;  %v2658_v53 = vcombine.high %v125_v50, %v125_v50  ;;  %v3149_v55 = vld [vmem:[#allocation5 + $0x168] ss:$16 sps:$4 sm:$0xff]   ;;  %v3157_v58 = vld [vmem:[#allocation5 + $0x18c] ss:$16 sps:$4 sm:$0xff]   ;;  %v2657_v8 = vcombine.low %v125_v50, %v125_v50 }
  0x84   :  { %1526 = vmatpush1.bf16.msra.mxu1 %v3101_v21  ;;  %1365 = vmatprep.subr.bf16.mxu0 %v3105_v23  ;;  %v3153_v57 = vld [vmem:[#allocation5 + $0x1a4] ss:$16 sps:$4 sm:$0xff]   ;;  %v3155_v59 = vld [vmem:[#allocation5 + $0x188] ss:$16 sps:$4 sm:$0xff]   ;;  %v3158_v60 = vld [vmem:[#allocation5 + $0x1a0] ss:$16 sps:$4 sm:$0xff]  }
  0x85   :  { %1527 = vmatprep.subr.bf16.mxu1 %v3109_v24  ;;  %1387 = vmatprep.mubr.bf16.mxu0 %v2658_v53  ;;  %v3159_v61 = vld [vmem:[#allocation5 + $0x1c4] ss:$16 sps:$4 sm:$0xff]   ;;  %v3163_v62 = vld [vmem:[#allocation5 + $0x1ac] ss:$16 sps:$4 sm:$0xff]   ;;  %v3161_v63 = vld [vmem:[#allocation5 + $0x1a8] ss:$16 sps:$4 sm:$0xff]  }
  0x86   :  { %1551 = vmatprep.mubr.bf16.mxu1 %v2658_v53  ;;  %v3164_v0 = vld [vmem:[#allocation5 + $0x1c0] ss:$16 sps:$4 sm:$0xff]   ;;  %v3165_v2 = vld [vmem:[#allocation5 + $0x1e4] ss:$16 sps:$4 sm:$0xff]   ;;  %v3169_v3 = vld [vmem:[#allocation5 + $0x1cc] ss:$16 sps:$4 sm:$0xff]  }
  0x87   :  { %1366 = vmatpush1.bf16.msra.mxu0 %v3110_v26  ;;  %v3167_v4 = vld [vmem:[#allocation5 + $0x1c8] ss:$16 sps:$4 sm:$0xff]   ;;  %v3170_v5 = vld [vmem:[#allocation5 + $0x1e0] ss:$16 sps:$4 sm:$0xff]   ;;  %v3175_v6 = vld [vmem:[#allocation5 + $0x204] ss:$16 sps:$4 sm:$0xff]  }
  0x88   :  { %1528 = vmatpush1.bf16.msra.mxu1 %v3107_v25  ;;  %1367 = vmatprep.subr.bf16.mxu0 %v3111_v27  ;;  %v3178_v7 = vld [vmem:[#allocation5 + $0x1ec] ss:$16 sps:$4 sm:$0xff]   ;;  %v3173_v9 = vld [vmem:[#allocation5 + $0x200] ss:$16 sps:$4 sm:$0xff]   ;;  %v3176_v10 = vld [vmem:[#allocation5 + $0x1e8] ss:$16 sps:$4 sm:$0xff]  }
  0x89   :  { %1529 = vmatprep.subr.bf16.mxu1 %v3115_v28  ;;  %v3181_v11 = vld [vmem:[#allocation5 + $0x224] ss:$16 sps:$4 sm:$0xff]   ;;  %v3184_v12 = vld [vmem:[#allocation5 + $0x20c] ss:$16 sps:$4 sm:$0xff]   ;;  %v3179_v13 = vld [vmem:[#allocation5 + $0x220] ss:$16 sps:$4 sm:$0xff]  }
  0x8a   :  { %v3182_v14 = vld [vmem:[#allocation5 + $0x208] ss:$16 sps:$4 sm:$0xff]   ;;  %v3187_v15 = vld [vmem:[#allocation5 + $0x244] ss:$16 sps:$4 sm:$0xff]   ;;  %v3190_v16 = vld [vmem:[#allocation5 + $0x22c] ss:$16 sps:$4 sm:$0xff]  }
  0x8b   :  { %1368 = vmatpush1.bf16.msra.mxu0 %v3116_v30  ;;  %v3185_v17 = vld [vmem:[#allocation5 + $0x240] ss:$16 sps:$4 sm:$0xff]   ;;  %v3188_v18 = vld [vmem:[#allocation5 + $0x228] ss:$16 sps:$4 sm:$0xff]   ;;  %v3193_v19 = vld [vmem:[#allocation5 + $0x264] ss:$16 sps:$4 sm:$0xff]  }
  0x8c   :  { %1530 = vmatpush1.bf16.msra.mxu1 %v3113_v29  ;;  %1369 = vmatprep.subr.bf16.mxu0 %v3117_v31  ;;  %v3196_v20 = vld [vmem:[#allocation5 + $0x24c] ss:$16 sps:$4 sm:$0xff]   ;;  %v3191_v21 = vld [vmem:[#allocation5 + $0x260] ss:$16 sps:$4 sm:$0xff]   ;;  %v3194_v22 = vld [vmem:[#allocation5 + $0x248] ss:$16 sps:$4 sm:$0xff]  }
  0x8d   :  { %1531 = vmatprep.subr.bf16.mxu1 %v3121_v32  ;;  %v3199_v23 = vld [vmem:[#allocation5 + $0x284] ss:$16 sps:$4 sm:$0xff]   ;;  %v3202_v24 = vld [vmem:[#allocation5 + $0x26c] ss:$16 sps:$4 sm:$0xff]   ;;  %v3197_v25 = vld [vmem:[#allocation5 + $0x280] ss:$16 sps:$4 sm:$0xff]  }
  0x8e   :  { %v3200_v26 = vld [vmem:[#allocation5 + $0x268] ss:$16 sps:$4 sm:$0xff]   ;;  %v3205_v27 = vld [vmem:[#allocation5 + $0x2a4] ss:$16 sps:$4 sm:$0xff]   ;;  %v3208_v28 = vld [vmem:[#allocation5 + $0x28c] ss:$16 sps:$4 sm:$0xff]  }
  0x8f   :  { %1370 = vmatpush1.bf16.msra.mxu0 %v3122_v34  ;;  %v3203_v29 = vld [vmem:[#allocation5 + $0x2a0] ss:$16 sps:$4 sm:$0xff]   ;;  %v3206_v30 = vld [vmem:[#allocation5 + $0x288] ss:$16 sps:$4 sm:$0xff]   ;;  %v3211_v31 = vld [vmem:[#allocation5 + $0x2c4] ss:$16 sps:$4 sm:$0xff]  }
  0x90   :  { %1532 = vmatpush1.bf16.msra.mxu1 %v3119_v33  ;;  %1371 = vmatprep.subr.bf16.mxu0 %v3123_v35  ;;  %v3214_v32 = vld [vmem:[#allocation5 + $0x2ac] ss:$16 sps:$4 sm:$0xff]   ;;  %v3209_v34 = vld [vmem:[#allocation5 + $0x2c0] ss:$16 sps:$4 sm:$0xff]   ;;  %v3212_v35 = vld [vmem:[#allocation5 + $0x2a8] ss:$16 sps:$4 sm:$0xff]  }
  0x91   :  { %1533 = vmatprep.subr.bf16.mxu1 %v3127_v36  ;;  %v3822_v33 = vld [vmem:[#allocation3 + $0x8] sm:$0xff]  ;;  %v3241_v53 = vld [vmem:[#allocation5 + $0x364] ss:$16 sps:$4 sm:$0xff]   ;;  %vm2566_vm2 = vcmask 523264   ;;  %vm2629_vm3 = vcmask 261120   ;;  %vm2647_vm4 = vcmask 7168  }
  0x92   :  { %v2660_v36 = vcombine.high %v3822_v33, %v3822_v33  ;;  %v3238_v50 = vld [vmem:[#allocation5 + $0x32c] ss:$16 sps:$4 sm:$0xff]  }
  0x93   :  { %1372 = vmatpush1.bf16.msra.mxu0 %v3128_v38  ;;  %v3220_v38 = vld [vmem:[#allocation5 + $0x2cc] ss:$16 sps:$4 sm:$0xff]  }
  0x94   :  { %1534 = vmatpush1.bf16.msra.mxu1 %v3125_v37  ;;  %1373 = vmatprep.subr.bf16.mxu0 %v3129_v39  ;;  %v3217_v37 = vld [vmem:[#allocation5 + $0x2e4] ss:$16 sps:$4 sm:$0xff]   ;;  %v3215_v39 = vld [vmem:[#allocation5 + $0x2e0] ss:$16 sps:$4 sm:$0xff]  }
  0x95   :  { %1535 = vmatprep.subr.bf16.mxu1 %v3133_v40  ;;  %v3218_v40 = vld [vmem:[#allocation5 + $0x2c8] ss:$16 sps:$4 sm:$0xff]  }
  0x97   :  { %1374 = vmatpush1.bf16.msra.mxu0 %v3134_v42  ;;  %v3226_v42 = vld [vmem:[#allocation5 + $0x2ec] ss:$16 sps:$4 sm:$0xff]  }
  0x98   :  { %1536 = vmatpush1.bf16.msra.mxu1 %v3131_v41  ;;  %1375 = vmatprep.subr.bf16.mxu0 %v3135_v43  ;;  %v3223_v41 = vld [vmem:[#allocation5 + $0x304] ss:$16 sps:$4 sm:$0xff]   ;;  %v3221_v43 = vld [vmem:[#allocation5 + $0x300] ss:$16 sps:$4 sm:$0xff]  }
  0x99   :  { %1537 = vmatprep.subr.bf16.mxu1 %v3139_v44  ;;  %v3224_v44 = vld [vmem:[#allocation5 + $0x2e8] ss:$16 sps:$4 sm:$0xff]  }
  0x9b   :  { %1376 = vmatpush1.bf16.msra.mxu0 %v3140_v46  ;;  %v3232_v46 = vld [vmem:[#allocation5 + $0x30c] ss:$16 sps:$4 sm:$0xff]  }
  0x9c   :  { %1538 = vmatpush1.bf16.msra.mxu1 %v3137_v45  ;;  %1377 = vmatprep.subr.bf16.mxu0 %v3141_v47  ;;  %v3229_v45 = vld [vmem:[#allocation5 + $0x324] ss:$16 sps:$4 sm:$0xff]   ;;  %v3227_v47 = vld [vmem:[#allocation5 + $0x320] ss:$16 sps:$4 sm:$0xff]  }
  0x9d   :  { %1539 = vmatprep.subr.bf16.mxu1 %v3145_v48  ;;  %v3230_v48 = vld [vmem:[#allocation5 + $0x308] ss:$16 sps:$4 sm:$0xff]  }
  0x9f   :  { %1378 = vmatpush1.bf16.msra.mxu0 %v3146_v51  ;;  %v3233_v51 = vld [vmem:[#allocation5 + $0x340] ss:$16 sps:$4 sm:$0xff]  }
  0xa0   :  { %1540 = vmatpush1.bf16.msra.mxu1 %v3143_v49  ;;  %1379 = vmatprep.subr.bf16.mxu0 %v3147_v52  ;;  %v3235_v49 = vld [vmem:[#allocation5 + $0x344] ss:$16 sps:$4 sm:$0xff]   ;;  %v3236_v52 = vld [vmem:[#allocation5 + $0x328] ss:$16 sps:$4 sm:$0xff]  }
  0xa1   :  { %1541 = vmatprep.subr.bf16.mxu1 %v3151_v54  ;;  %v3244_v54 = vld [vmem:[#allocation5 + $0x34c] ss:$16 sps:$4 sm:$0xff]  }
  0xa3   :  { %1380 = vmatpush1.bf16.msra.mxu0 %v3152_v56  ;;  %v3242_v56 = vld [vmem:[#allocation5 + $0x348] ss:$16 sps:$4 sm:$0xff]  }
  0xa4   :  { %1542 = vmatpush1.bf16.msra.mxu1 %v3149_v55  ;;  %1381 = vmatprep.subr.bf16.mxu0 %v3153_v57  ;;  %v3239_v55 = vld [vmem:[#allocation5 + $0x360] ss:$16 sps:$4 sm:$0xff]   ;;  %v3247_v57 = vld [vmem:[#allocation5 + $0x384] ss:$16 sps:$4 sm:$0xff]  }
  0xa5   :  { %1543 = vmatprep.subr.bf16.mxu1 %v3157_v58  ;;  %v3250_v58 = vld [vmem:[#allocation5 + $0x36c] ss:$16 sps:$4 sm:$0xff]  }
  0xa7   :  { %1382 = vmatpush1.bf16.msra.mxu0 %v3158_v60  ;;  %v3248_v60 = vld [vmem:[#allocation5 + $0x368] ss:$16 sps:$4 sm:$0xff]  }
  0xa8   :  { %1544 = vmatpush1.bf16.msra.mxu1 %v3155_v59  ;;  %1383 = vmatprep.subr.bf16.mxu0 %v3159_v61  ;;  %v3245_v59 = vld [vmem:[#allocation5 + $0x380] ss:$16 sps:$4 sm:$0xff]   ;;  %v3253_v61 = vld [vmem:[#allocation5 + $0x3a4] ss:$16 sps:$4 sm:$0xff]  }
  0xa9   :  { %1545 = vmatprep.subr.bf16.mxu1 %v3163_v62  ;;  %v3256_v62 = vld [vmem:[#allocation5 + $0x38c] ss:$16 sps:$4 sm:$0xff]  }
  0xab   :  { %1384 = vmatpush1.bf16.msra.mxu0 %v3164_v0  ;;  %v3254_v0 = vld [vmem:[#allocation5 + $0x388] ss:$16 sps:$4 sm:$0xff]  }
  0xac   :  { %1546 = vmatpush1.bf16.msra.mxu1 %v3161_v63  ;;  %1385 = vmatprep.subr.bf16.mxu0 %v3165_v2  ;;  %v3251_v63 = vld [vmem:[#allocation5 + $0x3a0] ss:$16 sps:$4 sm:$0xff]   ;;  %v3259_v2 = vld [vmem:[#allocation5 + $0x3c4] ss:$16 sps:$4 sm:$0xff]  }
  0xad   :  { %1547 = vmatprep.subr.bf16.mxu1 %v3169_v3  ;;  %v3262_v3 = vld [vmem:[#allocation5 + $0x3ac] ss:$16 sps:$4 sm:$0xff]  }
  0xaf   :  { %1386 = vmatpush1.bf16.msra.mxu0 %v3170_v5  ;;  %v3260_v5 = vld [vmem:[#allocation5 + $0x3a8] ss:$16 sps:$4 sm:$0xff]  }
  0xb0   :  { %1548 = vmatpush1.bf16.msra.mxu1 %v3167_v4  ;;  %1396 = vmatprep.subr.bf16.mxu0 %v3175_v6  ;;  %v3257_v4 = vld [vmem:[#allocation5 + $0x3c0] ss:$16 sps:$4 sm:$0xff]   ;;  %v3265_v6 = vld [vmem:[#allocation5 + $0x3e4] ss:$16 sps:$4 sm:$0xff]  }
  0xb1   :  { %1549 = vmatprep.subr.bf16.mxu1 %v3178_v7  ;;  %v3268_v7 = vld [vmem:[#allocation5 + $0x3cc] ss:$16 sps:$4 sm:$0xff]  }
  0xb2   :  { %1388 = vmatmul.mubr.bf16.vlgmr.msra.gmra.mrb[0].mxu0 %v2657_v8 }
  0xb3   :  { %1397 = vmatpush1.bf16.msra.mxu0 %v3173_v9  ;;  %1428 = vmatprep.mubr.bf16.mxu0 %v2660_v36  ;;  %v3266_v9 = vld [vmem:[#allocation5 + $0x3c8] ss:$16 sps:$4 sm:$0xff]  }
  0xb4   :  { %1550 = vmatpush1.bf16.msra.mxu1 %v3176_v10  ;;  %1398 = vmatprep.subr.bf16.mxu0 %v3181_v11  ;;  %v3273_v10 = vld [vmem:[#allocation5 + $0x404] ss:$16 sps:$4 sm:$0xff]   ;;  %v3276_v11 = vld [vmem:[#allocation5 + $0x3ec] ss:$16 sps:$4 sm:$0xff]  }
  0xb5   :  { %1560 = vmatprep.subr.bf16.mxu1 %v3184_v12  ;;  %v2659_v12 = vcombine.low %v3822_v33, %v3822_v33  ;;  %v3303_v33 = vld [vmem:[#allocation5 + $0x4a4] ss:$16 sps:$4 sm:$0xff]  }
  0xb7   :  { %1552 = vmatmul.mubr.bf16.vlgmr.msra.gmra.mrb[4].mxu1 %v2657_v8  ;;  %1399 = vmatpush1.bf16.msra.mxu0 %v3179_v13  ;;  %v3263_v8 = vld [vmem:[#allocation5 + $0x3e0] ss:$16 sps:$4 sm:$0xff]  }
  0xb8   :  { %1561 = vmatpush1.bf16.msra.mxu1 %v3182_v14  ;;  %1400 = vmatprep.subr.bf16.mxu0 %v3187_v15  ;;  %v3271_v13 = vld [vmem:[#allocation5 + $0x400] ss:$16 sps:$4 sm:$0xff]   ;;  %v3274_v14 = vld [vmem:[#allocation5 + $0x3e8] ss:$16 sps:$4 sm:$0xff]   ;;  %v3279_v15 = vld [vmem:[#allocation5 + $0x424] ss:$16 sps:$4 sm:$0xff]  }
  0xb9   :  { %1562 = vmatprep.subr.bf16.mxu1 %v3190_v16  ;;  %1592 = vmatprep.mubr.bf16.mxu1 %v2660_v36  ;;  %v3282_v16 = vld [vmem:[#allocation5 + $0x40c] ss:$16 sps:$4 sm:$0xff]   ;;  %v3304_v36 = vld [vmem:[#allocation5 + $0x488] ss:$16 sps:$4 sm:$0xff]  }
  0xbb   :  { %1401 = vmatpush1.bf16.msra.mxu0 %v3185_v17  ;;  %v3828_v17 = vld [vmem:[#allocation3 + $0x10] sm:$0xff] }
  0xbc   :  { %1563 = vmatpush1.bf16.msra.mxu1 %v3188_v18  ;;  %1402 = vmatprep.subr.bf16.mxu0 %v3193_v19  ;;  %v2662_v18 = vcombine.high %v3828_v17, %v3828_v17  ;;  %v3277_v19 = vld [vmem:[#allocation5 + $0x420] ss:$16 sps:$4 sm:$0xff]  }
  0xbd   :  { %1564 = vmatprep.subr.bf16.mxu1 %v3196_v20  ;;  %v3280_v20 = vld [vmem:[#allocation5 + $0x408] ss:$16 sps:$4 sm:$0xff]  }
  0xbf   :  { %1403 = vmatpush1.bf16.msra.mxu0 %v3191_v21  ;;  %v3285_v21 = vld [vmem:[#allocation5 + $0x444] ss:$16 sps:$4 sm:$0xff]  }
  0xc0   :  { %1565 = vmatpush1.bf16.msra.mxu1 %v3194_v22  ;;  %1404 = vmatprep.subr.bf16.mxu0 %v3199_v23  ;;  %v3288_v22 = vld [vmem:[#allocation5 + $0x42c] ss:$16 sps:$4 sm:$0xff]   ;;  %v3283_v23 = vld [vmem:[#allocation5 + $0x440] ss:$16 sps:$4 sm:$0xff]  }
  0xc1   :  { %1566 = vmatprep.subr.bf16.mxu1 %v3202_v24  ;;  %v3286_v24 = vld [vmem:[#allocation5 + $0x428] ss:$16 sps:$4 sm:$0xff]  }
  0xc3   :  { %1405 = vmatpush1.bf16.msra.mxu0 %v3197_v25  ;;  %v3291_v25 = vld [vmem:[#allocation5 + $0x464] ss:$16 sps:$4 sm:$0xff]  }
  0xc4   :  { %1567 = vmatpush1.bf16.msra.mxu1 %v3200_v26  ;;  %1406 = vmatprep.subr.bf16.mxu0 %v3205_v27  ;;  %v3294_v26 = vld [vmem:[#allocation5 + $0x44c] ss:$16 sps:$4 sm:$0xff]   ;;  %v3289_v27 = vld [vmem:[#allocation5 + $0x460] ss:$16 sps:$4 sm:$0xff]  }
  0xc5   :  { %1568 = vmatprep.subr.bf16.mxu1 %v3208_v28  ;;  %v3292_v28 = vld [vmem:[#allocation5 + $0x448] ss:$16 sps:$4 sm:$0xff]  }
  0xc7   :  { %1407 = vmatpush1.bf16.msra.mxu0 %v3203_v29  ;;  %v3297_v29 = vld [vmem:[#allocation5 + $0x484] ss:$16 sps:$4 sm:$0xff]  }
  0xc8   :  { %1569 = vmatpush1.bf16.msra.mxu1 %v3206_v30  ;;  %1408 = vmatprep.subr.bf16.mxu0 %v3211_v31  ;;  %v3300_v30 = vld [vmem:[#allocation5 + $0x46c] ss:$16 sps:$4 sm:$0xff]   ;;  %v3295_v31 = vld [vmem:[#allocation5 + $0x480] ss:$16 sps:$4 sm:$0xff]  }
  0xc9   :  { %1570 = vmatprep.subr.bf16.mxu1 %v3214_v32  ;;  %v3298_v32 = vld [vmem:[#allocation5 + $0x468] ss:$16 sps:$4 sm:$0xff]  }
  0xcb   :  { %1409 = vmatpush1.bf16.msra.mxu0 %v3209_v34  ;;  %v3306_v34 = vld [vmem:[#allocation5 + $0x48c] ss:$16 sps:$4 sm:$0xff]  }
  0xcc   :  { %1571 = vmatpush1.bf16.msra.mxu1 %v3212_v35  ;;  %1410 = vmatprep.subr.bf16.mxu0 %v3217_v37  ;;  %v3301_v35 = vld [vmem:[#allocation5 + $0x4a0] ss:$16 sps:$4 sm:$0xff]   ;;  %v3309_v37 = vld [vmem:[#allocation5 + $0x4c4] ss:$16 sps:$4 sm:$0xff]  }
  0xcd   :  { %1572 = vmatprep.subr.bf16.mxu1 %v3220_v38  ;;  %v3312_v38 = vld [vmem:[#allocation5 + $0x4ac] ss:$16 sps:$4 sm:$0xff]  }
  0xcf   :  { %1411 = vmatpush1.bf16.msra.mxu0 %v3215_v39  ;;  %v3307_v39 = vld [vmem:[#allocation5 + $0x4c0] ss:$16 sps:$4 sm:$0xff]  }
  0xd0   :  { %1573 = vmatpush1.bf16.msra.mxu1 %v3218_v40  ;;  %1412 = vmatprep.subr.bf16.mxu0 %v3223_v41  ;;  %v3310_v40 = vld [vmem:[#allocation5 + $0x4a8] ss:$16 sps:$4 sm:$0xff]   ;;  %v3315_v41 = vld [vmem:[#allocation5 + $0x4e4] ss:$16 sps:$4 sm:$0xff]  }
  0xd1   :  { %1574 = vmatprep.subr.bf16.mxu1 %v3226_v42  ;;  %v3318_v42 = vld [vmem:[#allocation5 + $0x4cc] ss:$16 sps:$4 sm:$0xff]  }
  0xd3   :  { %1413 = vmatpush1.bf16.msra.mxu0 %v3221_v43  ;;  %v3313_v43 = vld [vmem:[#allocation5 + $0x4e0] ss:$16 sps:$4 sm:$0xff]  }
  0xd4   :  { %1575 = vmatpush1.bf16.msra.mxu1 %v3224_v44  ;;  %1414 = vmatprep.subr.bf16.mxu0 %v3229_v45  ;;  %v3316_v44 = vld [vmem:[#allocation5 + $0x4c8] ss:$16 sps:$4 sm:$0xff]   ;;  %v3321_v45 = vld [vmem:[#allocation5 + $0x504] ss:$16 sps:$4 sm:$0xff]  }
  0xd5   :  { %1576 = vmatprep.subr.bf16.mxu1 %v3232_v46  ;;  %v3324_v46 = vld [vmem:[#allocation5 + $0x4ec] ss:$16 sps:$4 sm:$0xff]  }
  0xd7   :  { %1415 = vmatpush1.bf16.msra.mxu0 %v3227_v47  ;;  %v3319_v47 = vld [vmem:[#allocation5 + $0x500] ss:$16 sps:$4 sm:$0xff]  }
  0xd8   :  { %1577 = vmatpush1.bf16.msra.mxu1 %v3230_v48  ;;  %1416 = vmatprep.subr.bf16.mxu0 %v3235_v49  ;;  %v3322_v48 = vld [vmem:[#allocation5 + $0x4e8] ss:$16 sps:$4 sm:$0xff]   ;;  %v3327_v49 = vld [vmem:[#allocation5 + $0x524] ss:$16 sps:$4 sm:$0xff]  }
  0xd9   :  { %1578 = vmatprep.subr.bf16.mxu1 %v3238_v50  ;;  %v3330_v50 = vld [vmem:[#allocation5 + $0x50c] ss:$16 sps:$4 sm:$0xff]  }
  0xdb   :  { %1417 = vmatpush1.bf16.msra.mxu0 %v3233_v51  ;;  %v3325_v51 = vld [vmem:[#allocation5 + $0x520] ss:$16 sps:$4 sm:$0xff]  }
  0xdc   :  { %1579 = vmatpush1.bf16.msra.mxu1 %v3236_v52  ;;  %1418 = vmatprep.subr.bf16.mxu0 %v3241_v53  ;;  %v3328_v52 = vld [vmem:[#allocation5 + $0x508] ss:$16 sps:$4 sm:$0xff]   ;;  %v3333_v53 = vld [vmem:[#allocation5 + $0x544] ss:$16 sps:$4 sm:$0xff]  }
  0xdd   :  { %1580 = vmatprep.subr.bf16.mxu1 %v3244_v54  ;;  %v3336_v54 = vld [vmem:[#allocation5 + $0x52c] ss:$16 sps:$4 sm:$0xff]  }
  0xdf   :  { %1419 = vmatpush1.bf16.msra.mxu0 %v3239_v55  ;;  %v3331_v55 = vld [vmem:[#allocation5 + $0x540] ss:$16 sps:$4 sm:$0xff]  }
  0xe0   :  { %1581 = vmatpush1.bf16.msra.mxu1 %v3242_v56  ;;  %1420 = vmatprep.subr.bf16.mxu0 %v3247_v57  ;;  %v3334_v56 = vld [vmem:[#allocation5 + $0x528] ss:$16 sps:$4 sm:$0xff]   ;;  %v3339_v57 = vld [vmem:[#allocation5 + $0x564] ss:$16 sps:$4 sm:$0xff]  }
  0xe1   :  { %1582 = vmatprep.subr.bf16.mxu1 %v3250_v58  ;;  %v3342_v58 = vld [vmem:[#allocation5 + $0x54c] ss:$16 sps:$4 sm:$0xff]  }
  0xe3   :  { %1421 = vmatpush1.bf16.msra.mxu0 %v3245_v59  ;;  %v3337_v59 = vld [vmem:[#allocation5 + $0x560] ss:$16 sps:$4 sm:$0xff]  }
  0xe4   :  { %1583 = vmatpush1.bf16.msra.mxu1 %v3248_v60  ;;  %1422 = vmatprep.subr.bf16.mxu0 %v3253_v61  ;;  %v3340_v60 = vld [vmem:[#allocation5 + $0x548] ss:$16 sps:$4 sm:$0xff]   ;;  %v3345_v61 = vld [vmem:[#allocation5 + $0x584] ss:$16 sps:$4 sm:$0xff]  }
  0xe5   :  { %1584 = vmatprep.subr.bf16.mxu1 %v3256_v62  ;;  %v3348_v62 = vld [vmem:[#allocation5 + $0x56c] ss:$16 sps:$4 sm:$0xff]  }
  0xe7   :  { %1423 = vmatpush1.bf16.msra.mxu0 %v3251_v63  ;;  %v3343_v63 = vld [vmem:[#allocation5 + $0x580] ss:$16 sps:$4 sm:$0xff]  }
  0xe8   :  { %1585 = vmatpush1.bf16.msra.mxu1 %v3254_v0  ;;  %1424 = vmatprep.subr.bf16.mxu0 %v3259_v2  ;;  %v3346_v0 = vld [vmem:[#allocation5 + $0x568] ss:$16 sps:$4 sm:$0xff]   ;;  %v3351_v2 = vld [vmem:[#allocation5 + $0x5a4] ss:$16 sps:$4 sm:$0xff]  }
  0xe9   :  { %1586 = vmatprep.subr.bf16.mxu1 %v3262_v3  ;;  %v3354_v3 = vld [vmem:[#allocation5 + $0x58c] ss:$16 sps:$4 sm:$0xff]  }
  0xeb   :  { %1425 = vmatpush1.bf16.msra.mxu0 %v3257_v4  ;;  %v3349_v4 = vld [vmem:[#allocation5 + $0x5a0] ss:$16 sps:$4 sm:$0xff]  }
  0xec   :  { %1587 = vmatpush1.bf16.msra.mxu1 %v3260_v5  ;;  %1426 = vmatprep.subr.bf16.mxu0 %v3265_v6  ;;  %v3352_v5 = vld [vmem:[#allocation5 + $0x588] ss:$16 sps:$4 sm:$0xff]   ;;  %v3357_v6 = vld [vmem:[#allocation5 + $0x5c4] ss:$16 sps:$4 sm:$0xff]  }
  0xed   :  { %1588 = vmatprep.subr.bf16.mxu1 %v3268_v7  ;;  %v3360_v7 = vld [vmem:[#allocation5 + $0x5ac] ss:$16 sps:$4 sm:$0xff]  }
  0xef   :  { %1427 = vmatpush1.bf16.msra.mxu0 %v3263_v8  ;;  %v3355_v8 = vld [vmem:[#allocation5 + $0x5c0] ss:$16 sps:$4 sm:$0xff]  }
  0xf0   :  { %1589 = vmatpush1.bf16.msra.mxu1 %v3266_v9  ;;  %1437 = vmatprep.subr.bf16.mxu0 %v3273_v10  ;;  %v3358_v9 = vld [vmem:[#allocation5 + $0x5a8] ss:$16 sps:$4 sm:$0xff]   ;;  %v3363_v10 = vld [vmem:[#allocation5 + $0x5e4] ss:$16 sps:$4 sm:$0xff]  }
  0xf1   :  { %1590 = vmatprep.subr.bf16.mxu1 %v3276_v11  ;;  %v3366_v11 = vld [vmem:[#allocation5 + $0x5cc] ss:$16 sps:$4 sm:$0xff]  }
  0xf2   :  { %1429 = vmatmul.mubr.bf16.vlgmr.msra.gmra.mrb[0].mxu0 %v2659_v12 }
  0xf3   :  { %1438 = vmatpush1.bf16.msra.mxu0 %v3271_v13  ;;  %1469 = vmatprep.mubr.bf16.mxu0 %v2662_v18  ;;  %v3364_v13 = vld [vmem:[#allocation5 + $0x5c8] ss:$16 sps:$4 sm:$0xff]  }
  0xf4   :  { %1591 = vmatpush1.bf16.msra.mxu1 %v3274_v14  ;;  %1439 = vmatprep.subr.bf16.mxu0 %v3279_v15  ;;  %v3371_v14 = vld [vmem:[#allocation5 + $0x5ec] ss:$16 sps:$4 sm:$0xff]   ;;  %v3377_v15 = vld [vmem:[#allocation8 + $0x4] ss:$8 sps:$4 sm:$0xff]  }
  0xf5   :  { %1601 = vmatprep.subr.bf16.mxu1 %v3282_v16  ;;  %v2661_v16 = vcombine.low %v3828_v17, %v3828_v17  ;;  %v3381_v17 = vld [vmem:[#allocation8 + $0x20] ss:$8 sps:$4 sm:$0xff]  }
  0xf7   :  { %1593 = vmatmul.mubr.bf16.vlgmr.msra.gmra.mrb[4].mxu1 %v2659_v12  ;;  %1440 = vmatpush1.bf16.msra.mxu0 %v3277_v19  ;;  %v3361_v12 = vld [vmem:[#allocation5 + $0x5e0] ss:$16 sps:$4 sm:$0xff]   ;;  %v3375_v19 = vld [vmem:[#allocation8] ss:$8 sps:$4 sm:$0xff]  }
  0xf8   :  { %1602 = vmatpush1.bf16.msra.mxu1 %v3280_v20  ;;  %1441 = vmatprep.subr.bf16.mxu0 %v3285_v21  ;;  %v3374_v20 = vld [vmem:[#allocation5 + $0x60c] ss:$16 sps:$4 sm:$0xff]   ;;  %v3380_v21 = vld [vmem:[#allocation8 + $0x14] ss:$8 sps:$4 sm:$0xff]  }
  0xf9   :  { %1603 = vmatprep.subr.bf16.mxu1 %v3288_v22  ;;  %1633 = vmatprep.mubr.bf16.mxu1 %v2662_v18  ;;  %v3369_v18 = vld [vmem:[#allocation5 + $0x5e8] ss:$16 sps:$4 sm:$0xff]  }
  0xfa   :  { %v3372_v22 = vld [vmem:[#allocation5 + $0x608] ss:$16 sps:$4 sm:$0xff]  }
  0xfb   :  { %1442 = vmatpush1.bf16.msra.mxu0 %v3283_v23  ;;  %v3378_v23 = vld [vmem:[#allocation8 + $0x10] ss:$8 sps:$4 sm:$0xff]  }
  0xfc   :  { %1604 = vmatpush1.bf16.msra.mxu1 %v3286_v24  ;;  %1443 = vmatprep.subr.bf16.mxu0 %v3291_v25  ;;  %v3383_v24 = vld [vmem:[#allocation8 + $0x24] ss:$8 sps:$4 sm:$0xff]   ;;  %v3386_v25 = vld [vmem:[#allocation8 + $0x34] ss:$8 sps:$4 sm:$0xff]  }
  0xfd   :  { %1605 = vmatprep.subr.bf16.mxu1 %v3294_v26  ;;  %v3384_v26 = vld [vmem:[#allocation8 + $0x30] ss:$8 sps:$4 sm:$0xff]  }
  0xff   :  { %1444 = vmatpush1.bf16.msra.mxu0 %v3289_v27  ;;  %v3389_v27 = vld [vmem:[#allocation8 + $0x44] ss:$8 sps:$4 sm:$0xff]  }
 0x100   :  { %1606 = vmatpush1.bf16.msra.mxu1 %v3292_v28  ;;  %1445 = vmatprep.subr.bf16.mxu0 %v3297_v29  ;;  %v3387_v28 = vld [vmem:[#allocation8 + $0x40] ss:$8 sps:$4 sm:$0xff]   ;;  %v3392_v29 = vld [vmem:[#allocation8 + $0x54] ss:$8 sps:$4 sm:$0xff]  }
 0x101   :  { %1607 = vmatprep.subr.bf16.mxu1 %v3300_v30  ;;  %v3521_v30 = vld [vmem:[#allocation3 + $0x18] ss:$0 sps:$4 sm:$0xff]  }
 0x103   :  { %1446 = vmatpush1.bf16.msra.mxu0 %v3295_v31  ;;  %v3390_v31 = vld [vmem:[#allocation8 + $0x50] ss:$8 sps:$4 sm:$0xff]  }
 0x104   :  { %1608 = vmatpush1.bf16.msra.mxu1 %v3298_v32  ;;  %1447 = vmatprep.subr.bf16.mxu0 %v3303_v33  ;;  %v3395_v32 = vld [vmem:[#allocation8 + $0x64] ss:$8 sps:$4 sm:$0xff]  }
 0x105   :  { %1609 = vmatprep.subr.bf16.mxu1 %v3306_v34  ;;  %v3398_v34 = vld [vmem:[#allocation8 + $0x74] ss:$8 sps:$4 sm:$0xff]  }
 0x107   :  { %1448 = vmatpush1.bf16.msra.mxu0 %v3301_v35 }
 0x108   :  { %1610 = vmatpush1.bf16.msra.mxu1 %v3304_v36  ;;  %1449 = vmatprep.subr.bf16.mxu0 %v3309_v37 }
 0x109   :  { %1611 = vmatprep.subr.bf16.mxu1 %v3312_v38  ;;  %v3396_v38 = vld [vmem:[#allocation8 + $0x70] ss:$8 sps:$4 sm:$0xff]  }
 0x10b   :  { %1450 = vmatpush1.bf16.msra.mxu0 %v3307_v39  ;;  %v3401_v39 = vld [vmem:[#allocation8 + $0x84] ss:$8 sps:$4 sm:$0xff]  }
 0x10c   :  { %1612 = vmatpush1.bf16.msra.mxu1 %v3310_v40  ;;  %1451 = vmatprep.subr.bf16.mxu0 %v3315_v41  ;;  %v3399_v40 = vld [vmem:[#allocation8 + $0x80] ss:$8 sps:$4 sm:$0xff]   ;;  %v3404_v41 = vld [vmem:[#allocation8 + $0x94] ss:$8 sps:$4 sm:$0xff]  }
 0x10d   :  { %1613 = vmatprep.subr.bf16.mxu1 %v3318_v42  ;;  %v3402_v42 = vld [vmem:[#allocation8 + $0x90] ss:$8 sps:$4 sm:$0xff]  }
 0x10f   :  { %1452 = vmatpush1.bf16.msra.mxu0 %v3313_v43  ;;  %v3407_v43 = vld [vmem:[#allocation8 + $0xa4] ss:$8 sps:$4 sm:$0xff]  }
 0x110   :  { %1614 = vmatpush1.bf16.msra.mxu1 %v3316_v44  ;;  %1453 = vmatprep.subr.bf16.mxu0 %v3321_v45  ;;  %v3405_v44 = vld [vmem:[#allocation8 + $0xa0] ss:$8 sps:$4 sm:$0xff]   ;;  %v3410_v45 = vld [vmem:[#allocation8 + $0xb4] ss:$8 sps:$4 sm:$0xff]  }
 0x111   :  { %1615 = vmatprep.subr.bf16.mxu1 %v3324_v46  ;;  %v3408_v46 = vld [vmem:[#allocation8 + $0xb0] ss:$8 sps:$4 sm:$0xff]  }
 0x113   :  { %1454 = vmatpush1.bf16.msra.mxu0 %v3319_v47  ;;  %v3413_v47 = vld [vmem:[#allocation8 + $0xc4] ss:$8 sps:$4 sm:$0xff]  }
 0x114   :  { %1616 = vmatpush1.bf16.msra.mxu1 %v3322_v48  ;;  %1455 = vmatprep.subr.bf16.mxu0 %v3327_v49  ;;  %v3411_v48 = vld [vmem:[#allocation8 + $0xc0] ss:$8 sps:$4 sm:$0xff]   ;;  %v3416_v49 = vld [vmem:[#allocation8 + $0xd4] ss:$8 sps:$4 sm:$0xff]  }
 0x115   :  { %1617 = vmatprep.subr.bf16.mxu1 %v3330_v50  ;;  %v3414_v50 = vld [vmem:[#allocation8 + $0xd0] ss:$8 sps:$4 sm:$0xff]  }
 0x117   :  { %1456 = vmatpush1.bf16.msra.mxu0 %v3325_v51  ;;  %v3419_v51 = vld [vmem:[#allocation8 + $0xe4] ss:$8 sps:$4 sm:$0xff]  }
 0x118   :  { %1618 = vmatpush1.bf16.msra.mxu1 %v3328_v52  ;;  %1457 = vmatprep.subr.bf16.mxu0 %v3333_v53  ;;  %v3417_v52 = vld [vmem:[#allocation8 + $0xe0] ss:$8 sps:$4 sm:$0xff]   ;;  %v3422_v53 = vld [vmem:[#allocation8 + $0xf4] ss:$8 sps:$4 sm:$0xff]  }
 0x119   :  { %1619 = vmatprep.subr.bf16.mxu1 %v3336_v54  ;;  %v3420_v54 = vld [vmem:[#allocation8 + $0xf0] ss:$8 sps:$4 sm:$0xff]  }
 0x11b   :  { %1458 = vmatpush1.bf16.msra.mxu0 %v3331_v55  ;;  %v3425_v55 = vld [vmem:[#allocation8 + $0x104] ss:$8 sps:$4 sm:$0xff]  }
 0x11c   :  { %1620 = vmatpush1.bf16.msra.mxu1 %v3334_v56  ;;  %1459 = vmatprep.subr.bf16.mxu0 %v3339_v57  ;;  %v327_v56 = vlaneseq }
 0x11d   :  { %1621 = vmatprep.subr.bf16.mxu1 %v3342_v58 }
 0x11e   :  { %v3836_v57 = vshrl.u32 %v327_v56, 7 }
 0x11f   :  { %1460 = vmatpush1.bf16.msra.mxu0 %v3337_v59  ;;  %v3839_v59 = vld [vmem:[#allocation7] sm:$0xf] }
 0x120   :  { %1622 = vmatpush1.bf16.msra.mxu1 %v3340_v60  ;;  %1461 = vmatprep.subr.bf16.mxu0 %v3345_v61  ;;  %v329_v58 = vsub.s32 0, %v3836_v57  ;;  %v333_v60 = vsub.s32 1, %v3836_v57 }
 0x121   :  { %1623 = vmatprep.subr.bf16.mxu1 %v3348_v62 }
 0x122   :  { %v330_v61 = vrot.slane %v3839_v59, %v329_v58  ;;  %v334_v62 = vrot.slane %v3839_v59, %v333_v60 }
 0x123   :  { %1462 = vmatpush1.bf16.msra.mxu0 %v3343_v63 }
 0x124   :  { %1624 = vmatpush1.bf16.msra.mxu1 %v3346_v0  ;;  %1463 = vmatprep.subr.bf16.mxu0 %v3351_v2 }
 0x125   :  { %1625 = vmatprep.subr.bf16.mxu1 %v3354_v3 }
 0x127   :  { %1464 = vmatpush1.bf16.msra.mxu0 %v3349_v4 }
 0x128   :  { %1626 = vmatpush1.bf16.msra.mxu1 %v3352_v5  ;;  %1465 = vmatprep.subr.bf16.mxu0 %v3357_v6 }
 0x129   :  { %1627 = vmatprep.subr.bf16.mxu1 %v3360_v7 }
 0x12b   :  { %1466 = vmatpush1.bf16.msra.mxu0 %v3355_v8 }
 0x12c   :  { %1628 = vmatpush1.bf16.msra.mxu1 %v3358_v9  ;;  %1467 = vmatprep.subr.bf16.mxu0 %v3363_v10 }
 0x12d   :  { %1629 = vmatprep.subr.bf16.mxu1 %v3366_v11 }
 0x12f   :  { %1468 = vmatpush1.bf16.msra.mxu0 %v3361_v12 }
 0x130   :  { %1630 = vmatpush1.bf16.msra.mxu1 %v3364_v13  ;;  %2119 = vmatprep.subr.bf16.mxu0 %v3377_v15  ;;  %v341_v13 = vsub.s32 3, %v3836_v57 }
 0x131   :  { %1631 = vmatprep.subr.bf16.mxu1 %v3371_v14 }
 0x132   :  { %1470 = vmatmul.mubr.bf16.vlgmr.msra.gmra.mrb[0].mxu0 %v2661_v16 }
 0x133   :  { %2120 = vmatpush1.bf16.msra.mxu0 %v3375_v19  ;;  %v342_v19 = vrot.slane %v3839_v59, %v341_v13  ;;  %v3458_v13 = vld [vmem:[#allocation8 + $0x1b4] ss:$8 sps:$4 sm:$0xff]  }
 0x134   :  { %1632 = vmatpush1.bf16.msra.mxu1 %v3369_v18  ;;  %2121 = vmatprep.subr.bf16.mxu0 %v3380_v21 }
 0x135   :  { %1642 = vmatprep.subr.bf16.mxu1 %v3374_v20 }
 0x137   :  { %1634 = vmatmul.mubr.bf16.vlgmr.msra.gmra.mrb[4].mxu1 %v2661_v16  ;;  %2122 = vmatpush1.bf16.msra.mxu0 %v3378_v23 }
 0x138   :  { %1643 = vmatpush1.bf16.msra.mxu1 %v3372_v22  ;;  %1674 = vmatprep.mubr.bf16.mxu1 %v3672_v1  ;;  %v3393_v1 = vld [vmem:[#allocation8 + $0x60] ss:$8 sps:$4 sm:$0xff]  }
 0x139   :  { %2123 = vmatprep.subr.bf16.mxu0 %v3383_v24 }
 0x13b   :  { %2124 = vmatpush1.bf16.msra.mxu0 %v3381_v17 }
 0x13c   :  { %2125 = vmatprep.subr.bf16.mxu0 %v3386_v25 }
 0x13f   :  { %2126 = vmatpush1.bf16.msra.mxu0 %v3384_v26 }
 0x140   :  { %2127 = vmatprep.subr.bf16.mxu0 %v3389_v27 }
 0x143   :  { %2861 = vmatmul.mubr.msk.bf16.vlgmr.msra.gmra.mrb[4].mxu1 %vm1351_vm0, %v3521_v30  ;;  %2128 = vmatpush1.bf16.msra.mxu0 %v3387_v28 }
 0x144   :  { %2129 = vmatprep.subr.bf16.mxu0 %v3392_v29 }
 0x147   :  { %2130 = vmatpush1.bf16.msra.mxu0 %v3390_v31 }
 0x148   :  { %2131 = vmatprep.subr.bf16.mxu0 %v3395_v32 }
 0x14a   :  { %v1512_v33 = vpop.f32.mrb[0].mxu1 }
 0x14b   :  { %v1514_v35 = vpop.f32.mrb[1].mxu1  ;;  %2132 = vmatpush1.bf16.msra.mxu0 %v3393_v1 }
 0x14c   :  { %v1516_v36 = vpop.f32.mrb[2].mxu1  ;;  %2133 = vmatprep.subr.bf16.mxu0 %v3398_v34 }
 0x14d   :  { %v1517_v37 = vpop.f32.mrb[3].mxu1 }
 0x14f   :  { %2134 = vmatpush1.bf16.msra.mxu0 %v3396_v38 }
 0x150   :  { %2135 = vmatprep.subr.bf16.mxu0 %v3401_v39  ;;  %v3423_v39 = vld [vmem:[#allocation8 + $0x100] ss:$8 sps:$4 sm:$0xff]  }
 0x153   :  { %2136 = vmatpush1.bf16.msra.mxu0 %v3399_v40 }
 0x154   :  { %2137 = vmatprep.subr.bf16.mxu0 %v3404_v41  ;;  %v3428_v41 = vld [vmem:[#allocation8 + $0x114] ss:$8 sps:$4 sm:$0xff]  }
 0x157   :  { %2138 = vmatpush1.bf16.msra.mxu0 %v3402_v42  ;;  %v3426_v42 = vld [vmem:[#allocation8 + $0x110] ss:$8 sps:$4 sm:$0xff]  }
 0x158   :  { %2139 = vmatprep.subr.bf16.mxu0 %v3407_v43  ;;  %v3431_v43 = vld [vmem:[#allocation8 + $0x124] ss:$8 sps:$4 sm:$0xff]  }
 0x15b   :  { %2140 = vmatpush1.bf16.msra.mxu0 %v3405_v44  ;;  %v3429_v44 = vld [vmem:[#allocation8 + $0x120] ss:$8 sps:$4 sm:$0xff]  }
 0x15c   :  { %2141 = vmatprep.subr.bf16.mxu0 %v3410_v45  ;;  %v3434_v45 = vld [vmem:[#allocation8 + $0x134] ss:$8 sps:$4 sm:$0xff]  }
 0x15f   :  { %2142 = vmatpush1.bf16.msra.mxu0 %v3408_v46 }
 0x160   :  { %2143 = vmatprep.subr.bf16.mxu0 %v3413_v47  ;;  %v337_v47 = vsub.s32 2, %v3836_v57 }
 0x163   :  { %2144 = vmatpush1.bf16.msra.mxu0 %v3411_v48  ;;  %v3432_v48 = vld [vmem:[#allocation8 + $0x130] ss:$8 sps:$4 sm:$0xff]  }
 0x164   :  { %2145 = vmatprep.subr.bf16.mxu0 %v3416_v49 }
 0x167   :  { %2146 = vmatpush1.bf16.msra.mxu0 %v3414_v50 }
 0x168   :  { %2147 = vmatprep.subr.bf16.mxu0 %v3419_v51  ;;  %v3437_v51 = vld [vmem:[#allocation8 + $0x144] ss:$8 sps:$4 sm:$0xff]  }
 0x16b   :  { %2148 = vmatpush1.bf16.msra.mxu0 %v3417_v52 }
 0x16c   :  { %2149 = vmatprep.subr.bf16.mxu0 %v3422_v53  ;;  %v338_v53 = vrot.slane %v3839_v59, %v337_v47  ;;  %v3449_v59 = vld [vmem:[#allocation8 + $0x184] ss:$8 sps:$4 sm:$0xff]  }
 0x16f   :  { %2150 = vmatpush1.bf16.msra.mxu0 %v3420_v54  ;;  %v3435_v54 = vld [vmem:[#allocation8 + $0x140] ss:$8 sps:$4 sm:$0xff]  }
 0x170   :  { %2160 = vmatprep.subr.bf16.mxu0 %v3425_v55  ;;  %v3440_v55 = vld [vmem:[#allocation8 + $0x154] ss:$8 sps:$4 sm:$0xff]  }
 0x205   :  { %v1471_v63 = vpop.f32.mrb[0].mxu0 }
 0x206   :  { %v3029_v0 = vadd.f32 %v1471_v63, %v330_v61  ;;  %v1473_v2 = vpop.f32.mrb[1].mxu0  ;;  %v3438_v61 = vld [vmem:[#allocation8 + $0x150] ss:$8 sps:$4 sm:$0xff]  }
 0x207   :  { %v3031_v3 = vadd.f32 %v1473_v2, %v334_v62  ;;  %v1475_v4 = vpop.f32.mrb[2].mxu0  ;;  %v3443_v62 = vld [vmem:[#allocation8 + $0x164] ss:$8 sps:$4 sm:$0xff]   ;;  %v3446_v2 = vld [vmem:[#allocation8 + $0x174] ss:$8 sps:$4 sm:$0xff]  }
 0x208   :  { %v3030_v5 = vadd.f32 %v3029_v0, %v1512_v33  ;;  %v1476_v6 = vpop.f32.mrb[3].mxu0  ;;  %v3441_v0 = vld [vmem:[#allocation8 + $0x160] ss:$8 sps:$4 sm:$0xff]   ;;  %v3444_v4 = vld [vmem:[#allocation8 + $0x170] ss:$8 sps:$4 sm:$0xff]  }
 0x209   :  { %v3032_v7 = vadd.f32 %v3031_v3, %v1514_v35  ;;  %v3447_v6 = vld [vmem:[#allocation8 + $0x180] ss:$8 sps:$4 sm:$0xff]  }
 0x20a   :  { %v1683_v8 = vpack.c.bf16 %v3030_v5, %v3030_v5 }
 0x20b   :  { %v1684_v9 = vpack.c.bf16 %v3032_v7, %v3032_v7  ;;  %v3452_v7 = vld [vmem:[#allocation8 + $0x194] ss:$8 sps:$4 sm:$0xff]  }
 0x20c   :  { %v1691_v10 = vmul.bf16 1027030327, %v1683_v8  ;;  %v1687_v37 = vmul.bf16 1056980736, %v1683_v8 }
 0x20d   :  { %v1692_v11 = vmul.bf16 1027030327, %v1684_v9  ;;  %v1688_v34 = vmul.bf16 1056980736, %v1684_v9 }
 0x20e   :  { %v1695_v12 = vmul.bf16 %v1691_v10, %v1683_v8  ;;  %v3455_v10 = vld [vmem:[#allocation8 + $0x1a4] ss:$8 sps:$4 sm:$0xff]  }
 0x20f   :  { %v1696_v14 = vmul.bf16 %v1692_v11, %v1684_v9 }
 0x210   :  { %v1699_v15 = vmul.bf16 %v1695_v12, %v1683_v8  ;;  %v3453_v12 = vld [vmem:[#allocation8 + $0x1a0] ss:$8 sps:$4 sm:$0xff]  }
 0x211   :  { %v1700_v16 = vmul.bf16 %v1696_v14, %v1684_v9 }
 0x212   :  { %v1703_v18 = vadd.bf16 %v1699_v15, %v1683_v8  ;;  %v3456_v15 = vld [vmem:[#allocation8 + $0x1b0] ss:$8 sps:$4 sm:$0xff]  }
 0x213   :  { %v1704_v20 = vadd.bf16 %v1700_v16, %v1684_v9  ;;  %v3450_v9 = vld [vmem:[#allocation8 + $0x190] ss:$8 sps:$4 sm:$0xff]   ;;  %v3461_v16 = vld [vmem:[#allocation8 + $0x1c4] ss:$8 sps:$4 sm:$0xff]  }
 0x214   :  { %v1707_v21 = vmul.bf16 1061961548, %v1703_v18  ;;  %v3459_v18 = vld [vmem:[#allocation8 + $0x1c0] ss:$8 sps:$4 sm:$0xff]  }
 0x215   :  { %v1708_v23 = vmul.bf16 1061961548, %v1704_v20  ;;  %v3462_v20 = vld [vmem:[#allocation8 + $0x1d0] ss:$8 sps:$4 sm:$0xff]  }
 0x216   :  { %v1676_v22 = vpop.f32.mrb[4].mxu1  ;;  %3499 = vtanh.bf16 %v1707_v21  ;;  %v3467_v21 = vld [vmem:[#allocation8 + $0x1e4] ss:$8 sps:$4 sm:$0xff]  }
 0x217   :  { %v1678_v24 = vpop.f32.mrb[5].mxu1  ;;  %3501 = vtanh.bf16 %v1708_v23  ;;  %v3033_v56 = vadd.f32 %v1676_v22, %v338_v53  ;;  %v3465_v22 = vld [vmem:[#allocation8 + $0x1e0] ss:$8 sps:$4 sm:$0xff]   ;;  %v3470_v23 = vld [vmem:[#allocation8 + $0x1f4] ss:$8 sps:$4 sm:$0xff]  }
 0x218   :  { %v3034_v17 = vadd.f32 %v1678_v24, %v342_v19  ;;  %v1680_v25 = vpop.f32.mrb[6].mxu1  ;;  %v3464_v19 = vld [vmem:[#allocation8 + $0x1d4] ss:$8 sps:$4 sm:$0xff]  }
 0x219   :  { %v1681_v26 = vpop.f32.mrb[7].mxu1  ;;  %v1685_v63 = vpack.c.bf16 %v3033_v56, %v3033_v56 }
 0x21a   :  { %v1686_v27 = vpack.c.bf16 %v3034_v17, %v3034_v17  ;;  %v3468_v17 = vld [vmem:[#allocation8 + $0x1f0] ss:$8 sps:$4 sm:$0xff]  }
 0x21b   :  { %v1693_v3 = vmul.bf16 1027030327, %v1685_v63  ;;  %v1689_v26 = vmul.bf16 1056980736, %v1685_v63 }
 0x21c   :  { %v1694_v28 = vmul.bf16 1027030327, %v1686_v27  ;;  %v1690_v49 = vmul.bf16 1056980736, %v1686_v27 }
 0x21d   :  { %v1697_v5 = vmul.bf16 %v1693_v3, %v1685_v63 }
 0x21e   :  { %v1698_v29 = vmul.bf16 %v1694_v28, %v1686_v27  ;;  %v3471_v28 = vld [vmem:[%s3959_s5 + $0x40] sm:$0xff]  }
 0x21f   :  { %v1701_v8 = vmul.bf16 %v1697_v5, %v1685_v63  ;;  %2961 = vmatprep.subr.bf16.mxu1 %v3471_v28 }
 0x220   :  { %v1702_v30 = vmul.bf16 %v1698_v29, %v1686_v27  ;;  %v3472_v29 = vld [vmem:[%s3959_s5] sm:$0xff]  }
 0x221   :  { %v3500_v31 = vpop.eup %3499  ;;  %v1705_v11 = vadd.bf16 %v1701_v8, %v1685_v63  ;;  %2962 = vmatpush3.bf16.msra.mxu1 %v3472_v29 }
 0x222   :  { %v1706_v32 = vadd.bf16 %v1702_v30, %v1686_v27  ;;  %v3502_v1 = vpop.eup %3501  ;;  %v1715_v33 = vadd.bf16 1065369472, %v3500_v31  ;;  %v3473_v30 = vld [vmem:[%s3959_s5 + $0x48] sm:$0xff]  }
 0x223   :  { %v1716_v35 = vadd.bf16 1065369472, %v3502_v1  ;;  %v1709_v14 = vmul.bf16 1061961548, %v1705_v11  ;;  %v3474_v31 = vld [vmem:[%s3959_s5 + $0x8] sm:$0xff]   ;;  %2963 = vmatprep.subr.bf16.mxu1 %v3473_v30  ;;  %v3476_v1 = vld [vmem:[%s3959_s5 + $0x10] sm:$0xff]  }
 0x224   :  { %v1710_v36 = vmul.bf16 1061961548, %v1706_v32  ;;  %v1719_v40 = vmul.bf16 %v1715_v33, %v1687_v37  ;;  %v3475_v32 = vld [vmem:[%s3959_s5 + $0x50] sm:$0xff]   ;;  %v3477_v33 = vld [vmem:[%s3959_s5 + $0x58] sm:$0xff]   ;;  %v3481_v37 = vld [vmem:[%s3959_s5 + $0x68] sm:$0xff]  }
 0x225   :  { %v1720_v38 = vmul.bf16 %v1716_v35, %v1688_v34  ;;  %2964 = vmatpush3.bf16.msra.mxu1 %v3474_v31  ;;  %v3478_v34 = vld [vmem:[%s3959_s5 + $0x18] sm:$0xff]   ;;  %v3479_v35 = vld [vmem:[%s3959_s5 + $0x60] sm:$0xff]   ;;  %v3488_v11 = vld [vmem:[%s3961_s7 + $0x8] sm:$0xff]  }
 0x226   :  { %3503 = vtanh.bf16 %v1710_v36  ;;  %2965 = vmatprep.subr.bf16.mxu1 %v3475_v32  ;;  %v3480_v36 = vld [vmem:[%s3959_s5 + $0x20] sm:$0xff]  }
 0x227   :  { %2151 = vmatprep.mubr.bf16.mxu0 %v1720_v38  ;;  %3505 = vtanh.bf16 %v1709_v14  ;;  %v3482_v38 = vld [vmem:[%s3959_s5 + $0x28] sm:$0xff]   ;;  %v3491_v14 = vld [vmem:[%s3961_s7 + $0x20] sm:$0xff]  }
 0x228   :  { %2152 = vmatmul.mubr.bf16.vlgmr.msra.gmra.mrb[4].mxu0 %v1719_v40  ;;  %v3484_v40 = vld [vmem:[%s3959_s5 + $0x30] sm:$0xff]  }
 0x229   :  { %2161 = vmatpush1.bf16.msra.mxu0 %v3423_v39  ;;  %2966 = vmatpush3.bf16.msra.mxu1 %v3476_v1  ;;  %v3483_v39 = vld [vmem:[%s3959_s5 + $0x70] sm:$0xff]  }
 0x22a   :  { %2162 = vmatprep.subr.bf16.mxu0 %v3428_v41  ;;  %2967 = vmatprep.subr.bf16.mxu1 %v3477_v33  ;;  %v3485_v41 = vld [vmem:[%s3959_s5 + $0x78] sm:$0xff]  }
 0x22d   :  { %2163 = vmatpush1.bf16.msra.mxu0 %v3426_v42  ;;  %2968 = vmatpush3.bf16.msra.mxu1 %v3478_v34  ;;  %v3486_v42 = vld [vmem:[%s3959_s5 + $0x38] sm:$0xff]   ;;  %v3495_v34 = vld [vmem:[%s3963_s9] sm:$0xff]  }
 0x22e   :  { %2164 = vmatprep.subr.bf16.mxu0 %v3431_v43  ;;  %2969 = vmatprep.subr.bf16.mxu1 %v3479_v35  ;;  %v1787_v43 = vld [vmem:[%s3958_s4] sm:$0x3]  ;;  %v3496_v35 = vld [vmem:[%s3963_s9 + $0x8] sm:$0xff]  }
 0x231   :  { %v3504_v46 = vpop.eup %3503  ;;  %2165 = vmatpush1.bf16.msra.mxu0 %v3429_v44  ;;  %2970 = vmatpush3.bf16.msra.mxu1 %v3480_v36  ;;  %v1792_v44 = vrot.slane %v1787_v43, %v329_v58  ;;  %v3497_v36 = vld [vmem:[%s3963_s9 + $0x10] sm:$0xff]  }
 0x232   :  { %v1718_v50 = vadd.bf16 1065369472, %v3504_v46  ;;  %2166 = vmatprep.subr.bf16.mxu0 %v3434_v45  ;;  %v3506_v24 = vpop.eup %3505  ;;  %2971 = vmatprep.subr.bf16.mxu1 %v3481_v37  ;;  %v1796_v45 = vrot.slane %v1787_v43, %v333_v60  ;;  %v3498_v37 = vld [vmem:[%s3963_s9 + $0x18] sm:$0xff]  }
 0x233   :  { %v1717_v25 = vadd.bf16 1065369472, %v3506_v24 }
 0x234   :  { %v1722_v52 = vmul.bf16 %v1718_v50, %v1690_v49 }
 0x235   :  { %2167 = vmatpush1.bf16.msra.mxu0 %v3432_v48  ;;  %v1721_v27 = vmul.bf16 %v1717_v25, %v1689_v26  ;;  %2972 = vmatpush3.bf16.msra.mxu1 %v3482_v38  ;;  %v2943_v38 = vld [vmem:[#allocation11] ss:$0 sm:$0xff] }
 0x236   :  { %2192 = vmatprep.mubr.bf16.mxu0 %v1722_v52  ;;  %2168 = vmatprep.subr.bf16.mxu0 %v3437_v51 }
 0x237   :  { %2973 = vmatprep.subr.bf16.mxu1 %v3483_v39 }
 0x239   :  { %2169 = vmatpush1.bf16.msra.mxu0 %v3435_v54  ;;  %2974 = vmatpush3.bf16.msra.mxu1 %v3484_v40 }
 0x23a   :  { %2170 = vmatprep.subr.bf16.mxu0 %v3440_v55  ;;  %2975 = vmatprep.subr.bf16.mxu1 %v3485_v41 }
 0x23d   :  { %2171 = vmatpush1.bf16.msra.mxu0 %v3438_v61  ;;  %2976 = vmatpush3.bf16.msra.mxu1 %v3486_v42 }
 0x23e   :  { %2172 = vmatprep.subr.bf16.mxu0 %v3443_v62 }
 0x241   :  { %2173 = vmatpush1.bf16.msra.mxu0 %v3441_v0 }
 0x242   :  { %2174 = vmatprep.subr.bf16.mxu0 %v3446_v2 }
 0x245   :  { %2175 = vmatpush1.bf16.msra.mxu0 %v3444_v4 }
 0x246   :  { %2176 = vmatprep.subr.bf16.mxu0 %v3449_v59 }
 0x249   :  { %2177 = vmatpush1.bf16.msra.mxu0 %v3447_v6 }
 0x24a   :  { %2178 = vmatprep.subr.bf16.mxu0 %v3452_v7 }
 0x24d   :  { %2179 = vmatpush1.bf16.msra.mxu0 %v3450_v9  ;;  %v3487_v9 = vld [vmem:[%s3961_s7] sm:$0xff]  }
 0x24e   :  { %2180 = vmatprep.subr.bf16.mxu0 %v3455_v10  ;;  %v3673_v10 = vmov 0.0  }
 0x24f   :  { %2997 = vmatprep.subr.bf16.mxu1 %v3673_v10 }
 0x251   :  { %2181 = vmatpush1.bf16.msra.mxu0 %v3453_v12  ;;  %v3489_v12 = vld [vmem:[%s3961_s7 + $0x10] sm:$0xff]  }
 0x252   :  { %2182 = vmatprep.subr.bf16.mxu0 %v3458_v13  ;;  %v3490_v13 = vld [vmem:[%s3961_s7 + $0x18] sm:$0xff]  }
 0x255   :  { %2183 = vmatpush1.bf16.msra.mxu0 %v3456_v15  ;;  %v3492_v15 = vld [vmem:[%s3961_s7 + $0x28] sm:$0xff]  }
 0x256   :  { %2184 = vmatprep.subr.bf16.mxu0 %v3461_v16  ;;  %v3493_v16 = vld [vmem:[%s3961_s7 + $0x30] sm:$0xff]  }
 0x259   :  { %2185 = vmatpush1.bf16.msra.mxu0 %v3459_v18  ;;  %v3494_v18 = vld [vmem:[%s3961_s7 + $0x38] sm:$0xff]  }
 0x25a   :  { %2186 = vmatprep.subr.bf16.mxu0 %v3464_v19 }
 0x25d   :  { %2187 = vmatpush1.bf16.msra.mxu0 %v3462_v20  ;;  %v2926_v20 = vld [vmem:[#allocation10] ss:$0 sm:$0xff] }
 0x25e   :  { %2188 = vmatprep.subr.bf16.mxu0 %v3467_v21 }
 0x261   :  { %2189 = vmatpush1.bf16.msra.mxu0 %v3465_v22 }
 0x262   :  { %2190 = vmatprep.subr.bf16.mxu0 %v3470_v23 }
 0x265   :  { %2191 = vmatpush1.bf16.msra.mxu0 %v3468_v17 }
 0x268   :  { %2193 = vmatmul.mubr.bf16.vlgmr.msra.gmra.mrb[4].mxu0 %v1721_v27 }
 0x33b   :  { %v2194_v46 = vpop.f32.mrb[4].mxu0 }
 0x33c   :  { %v3035_v47 = vadd.f32 %v2194_v46, %v1792_v44  ;;  %v2196_v48 = vpop.f32.mrb[5].mxu0 }
 0x33d   :  { %v3036_v49 = vadd.f32 %v2196_v48, %v1796_v45  ;;  %v2198_v50 = vpop.f32.mrb[6].mxu0 }
 0x33e   :  { %v2201_v51 = vpack.c.bf16 %v3035_v47, %v3035_v47  ;;  %v2199_v52 = vpop.f32.mrb[7].mxu0 }
 0x33f   :  { %v2202_v53 = vpack.c.bf16 %v3036_v49, %v3036_v49 }
 0x340   :  { %v2205_v54 = vmul.bf16 1027030327, %v2201_v51  ;;  %v2203_v6 = vmul.bf16 1056980736, %v2201_v51 }
 0x341   :  { %v2206_v55 = vmul.bf16 1027030327, %v2202_v53  ;;  %v2204_v59 = vmul.bf16 1056980736, %v2202_v53 }
 0x342   :  { %v2207_v56 = vmul.bf16 %v2205_v54, %v2201_v51  ;;  %v2952_v54 = vld [vmem:[%s3964_s10] ss:$0 sm:$0xff] }
 0x343   :  { %v2208_v61 = vmul.bf16 %v2206_v55, %v2202_v53 }
 0x344   :  { %v2209_v62 = vmul.bf16 %v2207_v56, %v2201_v51 }
 0x345   :  { %v2210_v63 = vmul.bf16 %v2208_v61, %v2202_v53 }
 0x346   :  { %v2211_v0 = vadd.bf16 %v2209_v62, %v2201_v51 }
 0x347   :  { %v2212_v2 = vadd.bf16 %v2210_v63, %v2202_v53 }
 0x348   :  { %v2213_v58 = vmul.bf16 1061961548, %v2211_v0 }
 0x349   :  { %v2214_v3 = vmul.bf16 1061961548, %v2212_v2 }
 0x34a   :  { %3507 = vtanh.bf16 %v2213_v58 }
 0x34b   :  { %3509 = vtanh.bf16 %v2214_v3 }
 0x355   :  { %v3508_v57 = vpop.eup %3507 }
 0x356   :  { %v3510_v60 = vpop.eup %3509  ;;  %v2217_v4 = vadd.bf16 1065369472, %v3508_v57 }
 0x357   :  { %v2218_v5 = vadd.bf16 1065369472, %v3510_v60 }
 0x358   :  { %v2219_v8 = vmul.bf16 %v2217_v4, %v2203_v6 }
 0x359   :  { %v2220_v7 = vmul.bf16 %v2218_v5, %v2204_v59 }
 0x35b   :  { %2388 = vmatprep.mubr.bf16.mxu1 %v2220_v7  ;;  %v2958_v7 = vld [vmem:[%s3965_s11] ss:$0 sm:$0xff] }
 0x35c   :  { %2389 = vmatmul.mubr.bf16.vlgmr.msra.gmra.mrb[8].mxu1 %v2219_v8 }
 0x35d   :  { %2998 = vmatpush3.bf16.msra.mxu1 %v3487_v9  ;;  %3013 = vmatprep.mubr.msk.bf16.mxu1 %vm3674_vm1, %v3673_v10 }
 0x35e   :  { %2999 = vmatprep.subr.bf16.mxu1 %v3673_v10 }
 0x361   :  { %3000 = vmatpush3.bf16.msra.mxu1 %v3488_v11  ;;  %v2959_v11 = vld [vmem:[#allocation2] ss:$0 sm:$0xff] }
 0x362   :  { %3001 = vmatprep.subr.bf16.mxu1 %v3673_v10 }
 0x365   :  { %3002 = vmatpush3.bf16.msra.mxu1 %v3489_v12 }
 0x366   :  { %3003 = vmatprep.subr.bf16.mxu1 %v3673_v10 }
 0x369   :  { %3004 = vmatpush3.bf16.msra.mxu1 %v3490_v13 }
 0x36a   :  { %3005 = vmatprep.subr.bf16.mxu1 %v3673_v10 }
 0x36d   :  { %3006 = vmatpush3.bf16.msra.mxu1 %v3491_v14 }
 0x36e   :  { %3007 = vmatprep.subr.bf16.mxu1 %v3673_v10 }
 0x371   :  { %3008 = vmatpush3.bf16.msra.mxu1 %v3492_v15 }
 0x372   :  { %3009 = vmatprep.subr.bf16.mxu1 %v3673_v10 }
 0x375   :  { %3010 = vmatpush3.bf16.msra.mxu1 %v3493_v16 }
 0x376   :  { %3011 = vmatprep.subr.bf16.mxu1 %v3673_v10 }
 0x379   :  { %3012 = vmatpush3.bf16.msra.mxu1 %v3494_v18 }
 0x37a   :  { %3017 = vmatprep.subr.bf16.mxu1 %v3673_v10 }
 0x42f   :  { %v2977_v19 = vpop.f32.mrb[8].mxu1 }
 0x430   :  { %v2978_v21 = vpop.f32.mrb[9].mxu1 }
 0x431   :  { %v2979_v22 = vadd.f32 %v2978_v21, %v2977_v19  ;;  %v2980_v23 = vpop.f32.mrb[10].mxu1 }
 0x432   :  { %v2981_v24 = vpop.f32.mrb[11].mxu1 }
 0x433   :  { %v2391_v17 = vadd.f32 %v2979_v22, %v2926_v20 }
 0x435   :  { %v2396_v25 = vpack.c.bf16 %v2391_v17, %v2391_v17 }
 0x437   :  { %v2398_v26 = vmul.bf16 1027030327, %v2396_v25  ;;  %v2397_v32 = vmul.bf16 1056980736, %v2396_v25 }
 0x439   :  { %v2399_v27 = vmul.bf16 %v2398_v26, %v2396_v25 }
 0x43b   :  { %v2400_v28 = vmul.bf16 %v2399_v27, %v2396_v25 }
 0x43d   :  { %v2401_v29 = vadd.bf16 %v2400_v28, %v2396_v25 }
 0x43f   :  { %v2402_v30 = vmul.bf16 1061961548, %v2401_v29 }
 0x441   :  { %3511 = vtanh.bf16 %v2402_v30 }
 0x44c   :  { %v3512_v31 = vpop.eup %3511 }
 0x44d   :  { %v2404_v1 = vadd.bf16 1065369472, %v3512_v31 }
 0x44f   :  { %v2405_v33 = vmul.bf16 %v2404_v1, %v2397_v32 }
 0x451   :  { %3014 = vmatmul.mubr.bf16.vlgmr.msra.gmra.mrb[12].mxu1 %v2405_v33 }
 0x452   :  { %3025 = vmatprep.mubr.msk.bf16.mxu1 %vm3674_vm1, %v3673_v10  ;;  %3018 = vmatpush3.bf16.msra.mxu1 %v3495_v34 }
 0x453   :  { %3019 = vmatprep.subr.bf16.mxu1 %v3673_v10 }
 0x456   :  { %3020 = vmatpush3.bf16.msra.mxu1 %v3496_v35 }
 0x457   :  { %3021 = vmatprep.subr.bf16.mxu1 %v3673_v10 }
 0x45a   :  { %3022 = vmatpush3.bf16.msra.mxu1 %v3497_v36 }
 0x45b   :  { %3023 = vmatprep.subr.bf16.mxu1 %v3673_v10 }
 0x45e   :  { %3024 = vmatpush3.bf16.msra.mxu1 %v3498_v37 }
 0x524   :  { %v2511_v39 = vpop.f32.mrb[12].mxu1 }
 0x525   :  { %v2512_v40 = vadd.f32 %v2943_v38, %v2511_v39  ;;  %v3015_v41 = vpop.f32.mrb[13].mxu1 }
 0x526   :  { %v2514_v42 = vpop.f32.mrb[14].mxu1 }
 0x527   :  { %v2517_v43 = vpack.c.bf16 %v2512_v40, %v2512_v40  ;;  %v3016_v44 = vpop.f32.mrb[15].mxu1 }
 0x529   :  { %v2519_v45 = vmul.bf16 1027030327, %v2517_v43  ;;  %v2518_v51 = vmul.bf16 1056980736, %v2517_v43 }
 0x52b   :  { %v2520_v46 = vmul.bf16 %v2519_v45, %v2517_v43 }
 0x52d   :  { %v2521_v47 = vmul.bf16 %v2520_v46, %v2517_v43 }
 0x52f   :  { %v2522_v48 = vadd.bf16 %v2521_v47, %v2517_v43 }
 0x531   :  { %v2523_v49 = vmul.bf16 1061961548, %v2522_v48 }
 0x533   :  { %3513 = vtanh.bf16 %v2523_v49 }
 0x53e   :  { %v3514_v50 = vpop.eup %3513 }
 0x53f   :  { %v2525_v52 = vadd.bf16 1065369472, %v3514_v50 }
 0x541   :  { %v2526_v53 = vmul.bf16 %v2525_v52, %v2518_v51 }
 0x543   :  { %3026 = vmatmul.mubr.msk.bf16.vlgmr.msra.gmra.mrb[16].mxu1 %vm2566_vm2, %v2526_v53 }
 0x616   :  { %v2604_v55 = vpop.f32.mrb[16].mxu1 }
 0x617   :  { %v2605_v56 = vadd.f32 %v2952_v54, %v2604_v55  ;;  %v3027_v61 = vpop.f32.mrb[17].mxu1 }
 0x618   :  { %v2607_v62 = vpop.f32.mrb[18].mxu1 }
 0x619   :  { %v2610_v63 = vpack.c.bf16 %v2605_v56, %v2605_v56  ;;  %v3028_v0 = vpop.f32.mrb[19].mxu1 }
 0x61b   :  { %v2612_v2 = vmul.bf16 1027030327, %v2610_v63  ;;  %v2611_v59 = vmul.bf16 1056980736, %v2610_v63 }
 0x61d   :  { %v2613_v58 = vmul.bf16 %v2612_v2, %v2610_v63 }
 0x61f   :  { %v2614_v3 = vmul.bf16 %v2613_v58, %v2610_v63 }
 0x621   :  { %v2615_v57 = vadd.bf16 %v2614_v3, %v2610_v63 }
 0x623   :  { %v2616_v60 = vmul.bf16 1061961548, %v2615_v57 }
 0x625   :  { %3515 = vtanh.bf16 %v2616_v60 }
 0x630   :  { %v3516_v4 = vpop.eup %3515 }
 0x631   :  { %v2618_v5 = vadd.bf16 1065369472, %v3516_v4 }
 0x633   :  { %v2619_v6 = vmul.bf16 %v2618_v5, %v2611_v59 }
 0x635   :  { %v2620_v8 = vunpack.c.l.bf16 %v2619_v6 }
 0x637   :  { %v2628_v9 = vmul.f32 %v2958_v7, %v2620_v8 }
 0x639   :  { %v2630_v10 = vsel %vm2629_vm3, %v2628_v9, 0.0 }
 0x63a   :  { %2631 = vadd.xlane.f32.xlu0 %v2630_v10 }
 0x6c7   :  { %v2632_v12 = vpop.xlane.xlu0 %2631 }
 0x6c8   :  { %v2640_v13 = vadd.f32 %v2959_v11, %v2632_v12 }
 0x6ca   :  { %v2960_v14 = vmul.f32 -1.442695, %v2640_v13 }
 0x6cc   :  { %3517 = vpow2.f32 %v2960_v14 }
 0x6d6   :  { %v3518_v15 = vpop.eup %3517 }
 0x6d7   :  { %v2644_v16 = vadd.f32 1.0, %v3518_v15 }
 0x6d9   :  { %3519 = vrcp.f32 %v2644_v16 }
 0x6e3   :  { %v3520_v18 = vpop.eup %3519 }
 0x6e4   :  { %2648 = vst.msk [vmem:[%s3967_s13] sm:$0xff] %vm2647_vm4, %v3520_v18 }
 0x6e5   :  { %2653 = vsyncpa [#allocation4], 1 }
 0x6e6   :  { %2654 = vsyncpa [#allocation6], 1 }
 0x6e7   :  { %2655 = vsyncpa [#allocation9], 1 }
 0x6e8   :  { %2656 = vsyncpa [#allocation12], 1 }

</bundles_post_ra>
